<compile_context>
chip_gen: v6e
topology: v6e:2x2x1
jax: 0.10.0
libtpu: 0.0.40
codegen_flags: <defaults>
</compile_context>

<pallas_src>
import jax
import jax.numpy as jnp
from jax.experimental import pallas as pl
from jax.experimental.pallas import tpu as pltpu


def _decoder_kernel(x_ref, h0_ref, c0_ref, wih0_ref, wihr_ref, whh_ref, b_ref,
                    wfc_ref, bfc_ref,
                    pred_ref, hout_ref, cout_ref,
                    seq_ref, pre_ref):
    """Full multi-layer LSTM + output projection, (T,B) flattened onto sublanes.

    x_ref    : (T*B, Dp)     input sequence (time-major, flattened), D zero-padded -> Dp
    h0_ref   : (L, B, H)     initial hidden state
    c0_ref   : (L, B, H)     initial cell state
    wih0_ref : (Dp, 4H)      layer-0 fused input weights   (gate order i|f|o|g)
    wihr_ref : (L-1, H, 4H)  layers>=1 fused input weights (dummy (1,H,4H) if L==1)
    whh_ref  : (L, H, 4H)    fused recurrent weights
    b_ref    : (L, 1, 4H)    fused combined bias (b_ih + b_hh), f32
    wfc_ref  : (H, P)        output projection weight, zero-padded D -> P=128
    bfc_ref  : (1, P)        output projection bias, zero-padded, f32
    pred_ref : (T*B, P)      lane-dense prediction slab (sliced to D outside)
    hout_ref : (L, B, H)     final hidden state
    cout_ref : (L, B, H)     final cell state
    seq_ref  : (T*B, H)      VMEM scratch: current layer's output sequence
    pre_ref  : (T*B, 4H)     VMEM scratch: hoisted input-path pre-gates
    """
    L, B, H = h0_ref.shape
    TB = seq_ref.shape[0]
    T = TB // B
    mm_dtype = whh_ref.dtype          # f32 default; bf16 on v6e/v7x via wrapper

    for layer in range(L):            # static python loop (L known at trace time)
        w_hh = whh_ref[layer]         # (H, 4H) — one contiguous lane-dense load
        bias = b_ref[layer]           # (1, 4H), f32

        # Hoisted input path: ONE 2-D matmul + bias for the whole flattened
        # sequence.  Layer 0 reads x_ref directly (no seq copy).
        if layer == 0:
            src = x_ref[...]                      # (TB, Dp)
            w_ih = wih0_ref[...]                  # (Dp, 4H)
        else:
            src = seq_ref[...]                    # (TB, H)
            w_ih = wihr_ref[layer - 1]            # (H, 4H)
        pre_ref[...] = jnp.dot(src.astype(mm_dtype), w_ih,
                               preferred_element_type=jnp.float32) + bias

        h = h0_ref[layer]                         # (B, H) f32
        c = c0_ref[layer]                         # (B, H) f32

        # Serial recurrence: only one (B,H)@(H,4H) MXU matmul + two full-width
        # EUP passes + a few VPU muls per step on the critical path.
        # Fully unrolled static loop (static row slices) — safe at H=32.
        # TODO(synk): for H >> 128 switch to partial unroll (lax.fori_loop
        #   unroll=2..4) to bound vreg live ranges, and stage W_hh in the MXU
        #   explicitly (pltpu.matmul_push_rhs once per layer, acc/pop per step;
        #   on v7x use the MRB to fuse the pre-gate add and drop pre_ref).
        for t in range(T):
            gates = pre_ref[pl.ds(t * B, B), :] + jnp.dot(
                h.astype(mm_dtype), w_hh, preferred_element_type=jnp.float32)
            # gates packed i|f|o|g -> 2 EUP passes instead of 4.
            sig = jax.nn.sigmoid(gates[:, :3 * H])      # i|f|o together
            g_g = jnp.tanh(gates[:, 3 * H:])            # cell candidate
            i_g = sig[:, :H]
            f_g = sig[:, H:2 * H]
            o_g = sig[:, 2 * H:3 * H]
            c = f_g * c + i_g * g_g
            h = o_g * jnp.tanh(c)
            # This layer's output row-block becomes next layer's input.  Safe:
            # pre_ref was fully materialized before the recurrence started.
            seq_ref[pl.ds(t * B, B), :] = h

        hout_ref[layer] = h
        cout_ref[layer] = c

    # Lane-dense output projection over the whole flattened sequence:
    # (T*B, H) @ (H, P=128) + b -> unmasked 128-lane stores.
    pred_ref[...] = jnp.dot(seq_ref[...].astype(mm_dtype), wfc_ref[...],
                            preferred_element_type=jnp.float32) + bfc_ref[...]


def decoder_forward(params, input_step, hidden, cell,
                    matmul_dtype=jnp.float32):
    """Pallas-backed forward.

    input_step: (B, T, D); hidden/cell: (L, B, H) (PyTorch conventions).
    matmul_dtype: jnp.float32 (default) or jnp.bfloat16 on v6e/v7x for full
    MXU rate + halved weight DMA (state/elementwise math stays f32).
    """
    wih0, wihr, whh, b, wfc, bfc = params
    B, T, D = input_step.shape
    L, _, H = hidden.shape
    P = wfc.shape[1]                  # lane-dense padded output width (128)
    Dp = wih0.shape[0]                # capped feature pad of D

    # time-major, flatten (T,B) onto the sublane axis, pad features D -> Dp.
    x_t = jnp.transpose(input_step, (1, 0, 2)).astype(jnp.float32)
    x_flat = jnp.zeros((T * B, Dp), jnp.float32).at[:, :D].set(
        x_t.reshape(T * B, D))

    vmem = pl.BlockSpec(memory_space=pltpu.MemorySpace.VMEM)

    # NOTE: grid-less call — everything fits VMEM at these shapes.  For
    # production shapes: add a batch grid axis marked "parallel" (v7x 2 TCs)
    # and time-chunk/double-buffer the pre-gate scratch.
    pred_flat, h_out, c_out = pl.pallas_call(
        _decoder_kernel,
        out_shape=(
            jax.ShapeDtypeStruct((T * B, P), jnp.float32),
            jax.ShapeDtypeStruct((L, B, H), jnp.float32),
            jax.ShapeDtypeStruct((L, B, H), jnp.float32),
        ),
        in_specs=[vmem] * 9,
        out_specs=(vmem, vmem, vmem),
        scratch_shapes=[pltpu.VMEM((T * B, H), jnp.float32),       # seq
                        pltpu.VMEM((T * B, 4 * H), jnp.float32)],  # pre-gates
        compiler_params=pltpu.CompilerParams(
            vmem_limit_bytes=32 * 1024 * 1024),
    )(x_flat,
      hidden.astype(jnp.float32), cell.astype(jnp.float32),
      wih0.astype(matmul_dtype), wihr.astype(matmul_dtype),
      whh.astype(matmul_dtype), b,
      wfc.astype(matmul_dtype), bfc)

    pred = pred_flat[:, :D].reshape(T, B, D)
    prediction = jnp.transpose(pred, (1, 0, 2))                    # (B, T, D)
    return prediction, h_out, c_out


def _repack_gates(m, H):
    """Reorder PyTorch gate order i|f|g|o -> kernel order i|f|o|g along axis 0."""
    return jnp.concatenate([m[0:H], m[H:2 * H], m[3 * H:4 * H], m[2 * H:3 * H]],
                           axis=0)


def init_params(key, output_dim, hidden_dim, num_layers):
    """Deterministic synthetic parameters packed into kernel-friendly layout.

    * per-layer weights fused to (in_dim, 4H), gate order i|f|o|g on the 4H axis
    * layer-0 input weights kept separate, input dim padded only D -> Dp=8
    * FC head zero-padded D -> 128 so the kernel stores lane-dense
    """
    D, H, L = output_dim, hidden_dim, num_layers
    P = max(128, ((D + 127) // 128) * 128)
    Dp = ((D + 7) // 8) * 8
    keys = jax.random.split(key, 4 * L + 2)
    scale = 0.1

    wih0 = None
    wihr_l, whh_l, b_l = [], [], []
    idx = 0
    for layer in range(L):
        in_dim = D if layer == 0 else H
        w_ih = jax.random.normal(keys[idx], (4 * H, in_dim), jnp.float32) * scale; idx += 1
        w_hh = jax.random.normal(keys[idx], (4 * H, H), jnp.float32) * scale;      idx += 1
        b_ih = jax.random.normal(keys[idx], (4 * H,), jnp.float32) * scale;        idx += 1
        b_hh = jax.random.normal(keys[idx], (4 * H,), jnp.float32) * scale;        idx += 1

        w_ih_p = _repack_gates(w_ih, H).T                         # (in_dim, 4H)
        w_hh_p = _repack_gates(w_hh, H).T                         # (H, 4H)
        b_p = _repack_gates(b_ih + b_hh, H).reshape(1, 4 * H)     # (1, 4H)

        if layer == 0:
            wih0 = jnp.zeros((Dp, 4 * H), jnp.float32).at[:in_dim].set(w_ih_p)
        else:
            wihr_l.append(w_ih_p)
        whh_l.append(w_hh_p)
        b_l.append(b_p)

    if not wihr_l:                                # L == 1: dummy, never read
        wihr_l.append(jnp.zeros((H, 4 * H), jnp.float32))

    w_fc = jax.random.normal(keys[idx], (D, H), jnp.float32) * scale; idx += 1
    b_fc = jax.random.normal(keys[idx], (D,), jnp.float32) * scale
    wfc_pad = jnp.zeros((H, P), jnp.float32).at[:, :D].set(w_fc.T)    # (H, P)
    bfc_pad = jnp.zeros((1, P), jnp.float32).at[0, :D].set(b_fc)      # (1, P)

    return (wih0, jnp.stack(wihr_l), jnp.stack(whh_l), jnp.stack(b_l),
            wfc_pad, bfc_pad)


def decoder_reference(params, input_step, hidden, cell):
    """Pure-JAX reference with identical LSTM math (highest matmul precision)."""
    wih0, wihr, whh, b, wfc, bfc = params
    B, T, D = input_step.shape
    L, _, H = hidden.shape
    Dp = wih0.shape[0]
    hp = jax.lax.Precision.HIGHEST

    x = jnp.transpose(input_step, (1, 0, 2)).astype(jnp.float32)      # (T, B, D)
    seq = jnp.zeros((T, B, Dp), jnp.float32).at[:, :, :D].set(x)
    h_fin, c_fin = [], []
    for layer in range(L):
        w_ih = wih0 if layer == 0 else wihr[layer - 1]
        h, c = hidden[layer], cell[layer]
        outs = []
        for t in range(T):
            gates = (jnp.dot(seq[t], w_ih, precision=hp)
                     + jnp.dot(h, whh[layer], precision=hp)
                     + b[layer])
            i_g = jax.nn.sigmoid(gates[:, 0 * H:1 * H])
            f_g = jax.nn.sigmoid(gates[:, 1 * H:2 * H])
            o_g = jax.nn.sigmoid(gates[:, 2 * H:3 * H])
            g_g = jnp.tanh(gates[:, 3 * H:4 * H])
            c = f_g * c + i_g * g_g
            h = o_g * jnp.tanh(c)
            outs.append(h)
        seq = jnp.stack(outs, 0)
        h_fin.append(h); c_fin.append(c)
    pred = jnp.einsum('tbh,hp->tbp', seq, wfc, precision=hp) + bfc
    pred = pred[:, :, :D]
    return jnp.transpose(pred, (1, 0, 2)), jnp.stack(h_fin), jnp.stack(c_fin)


if __name__ == "__main__":
    # Shapes consistent with the module: output_dim=2, hidden_dim=32,
    # num_layers=2, batch=2, seq=8.
    B, T, D, H, L = 2, 8, 2, 32, 2
    key = jax.random.PRNGKey(0)
    k_x, k_h, k_c, k_p = jax.random.split(key, 4)

    input_step = jax.random.normal(k_x, (B, T, D), jnp.float32)
    hidden = jax.random.normal(k_h, (L, B, H), jnp.float32) * 0.1
    cell = jax.random.normal(k_c, (L, B, H), jnp.float32) * 0.1
    params = init_params(k_p, D, H, L)

    pred, h_out, c_out = decoder_forward(params, input_step, hidden, cell)
    jax.block_until_ready((pred, h_out, c_out))

    ref_pred, ref_h, ref_c = decoder_reference(params, input_step, hidden, cell)
    assert pred.shape == (B, T, D)
    assert h_out.shape == (L, B, H) and c_out.shape == (L, B, H)
    for got, ref in ((pred, ref_pred), (h_out, ref_h), (c_out, ref_c)):
        assert jnp.allclose(got, ref, rtol=1e-2, atol=1e-2), "mismatch vs reference"

    print("KERNEL_OK")
</pallas_src>

<mosaic_0001>
module attributes {stable_mosaic.version = 11 : i64} {
  func.func @_decoder_kernel(%arg0: memref<16x8xf32, #tpu.memory_space<vmem>>, %arg1: memref<2x2x32xf32, #tpu.memory_space<vmem>>, %arg2: memref<2x2x32xf32, #tpu.memory_space<vmem>>, %arg3: memref<8x128xf32, #tpu.memory_space<vmem>>, %arg4: memref<1x32x128xf32, #tpu.memory_space<vmem>>, %arg5: memref<2x32x128xf32, #tpu.memory_space<vmem>>, %arg6: memref<2x1x128xf32, #tpu.memory_space<vmem>>, %arg7: memref<32x128xf32, #tpu.memory_space<vmem>>, %arg8: memref<1x128xf32, #tpu.memory_space<vmem>>, %arg9: memref<16x128xf32, #tpu.memory_space<vmem>>, %arg10: memref<2x2x32xf32, #tpu.memory_space<vmem>>, %arg11: memref<2x2x32xf32, #tpu.memory_space<vmem>>, %arg12: memref<16x32xf32, #tpu.memory_space<vmem>>, %arg13: memref<16x128xf32, #tpu.memory_space<vmem>>) attributes {dimension_semantics = [], scalar_prefetch = 0 : i64, scratch_operands = 2 : i64, tpu.core_type = #tpu.core_type<tc>} {
    %c0 = arith.constant 0 : index
    %c0_0 = arith.constant 0 : index
    %c0_1 = arith.constant 0 : index
    %0 = vector.load %arg5[%c0, %c0_0, %c0_1] : memref<2x32x128xf32, #tpu.memory_space<vmem>>, vector<1x32x128xf32>
    %1 = vector.shape_cast %0 : vector<1x32x128xf32> to vector<32x128xf32>
    %c0_2 = arith.constant 0 : index
    %c0_3 = arith.constant 0 : index
    %c0_4 = arith.constant 0 : index
    %2 = vector.load %arg6[%c0_2, %c0_3, %c0_4] : memref<2x1x128xf32, #tpu.memory_space<vmem>>, vector<1x1x128xf32>
    %3 = vector.shape_cast %2 : vector<1x1x128xf32> to vector<1x128xf32>
    %c0_5 = arith.constant 0 : index
    %c0_6 = arith.constant 0 : index
    %4 = vector.load %arg0[%c0_5, %c0_6] : memref<16x8xf32, #tpu.memory_space<vmem>>, vector<16x8xf32>
    %c0_7 = arith.constant 0 : index
    %c0_8 = arith.constant 0 : index
    %5 = vector.load %arg3[%c0_7, %c0_8] : memref<8x128xf32, #tpu.memory_space<vmem>>, vector<8x128xf32>
    %cst = arith.constant dense<0.000000e+00> : vector<16x128xf32>
    %6 = tpu.matmul %4, %5, %cst {dimension_numbers = #tpu.dot_dimension_numbers<[1], [0], [0], [1], [0, 0, 1, 1], [], []>} : vector<16x8xf32>, vector<8x128xf32>, vector<16x128xf32> -> vector<16x128xf32>
    %7 = vector.broadcast %3 : vector<1x128xf32> to vector<16x128xf32>
    %8 = arith.addf %6, %7 : vector<16x128xf32>
    %c0_9 = arith.constant 0 : index
    %c0_10 = arith.constant 0 : index
    %9 = vector.load %arg13[%c0_9, %c0_10] : memref<16x128xf32, #tpu.memory_space<vmem>>, vector<16x128xf32>
    tpu.vector_store %arg13[%c0_9, %c0_10], %8 {strides = array<i32>} : memref<16x128xf32, #tpu.memory_space<vmem>>, vector<16x128xf32>,
    %c0_11 = arith.constant 0 : index
    %c0_12 = arith.constant 0 : index
    %c0_13 = arith.constant 0 : index
    %10 = vector.load %arg1[%c0_11, %c0_12, %c0_13] : memref<2x2x32xf32, #tpu.memory_space<vmem>>, vector<1x2x32xf32>
    %11 = vector.shape_cast %10 : vector<1x2x32xf32> to vector<2x32xf32>
    %c0_14 = arith.constant 0 : index
    %c0_15 = arith.constant 0 : index
    %c0_16 = arith.constant 0 : index
    %12 = vector.load %arg2[%c0_14, %c0_15, %c0_16] : memref<2x2x32xf32, #tpu.memory_space<vmem>>, vector<1x2x32xf32>
    %13 = vector.shape_cast %12 : vector<1x2x32xf32> to vector<2x32xf32>
    %c0_17 = arith.constant 0 : index
    %c0_18 = arith.constant 0 : index
    %14 = vector.load %arg13[%c0_17, %c0_18] : memref<16x128xf32, #tpu.memory_space<vmem>>, vector<2x128xf32>
    %cst_19 = arith.constant dense<0.000000e+00> : vector<2x128xf32>
    %15 = tpu.matmul %11, %1, %cst_19 {dimension_numbers = #tpu.dot_dimension_numbers<[1], [0], [0], [1], [0, 0, 1, 1], [], []>} : vector<2x32xf32>, vector<32x128xf32>, vector<2x128xf32> -> vector<2x128xf32>
    %16 = arith.addf %14, %15 : vector<2x128xf32>
    %17 = vector.extract_strided_slice %16 {offsets = [0, 0], sizes = [2, 96], strides = [1, 1]} : vector<2x128xf32> to vector<2x96xf32>
    %18 = arith.negf %17 : vector<2x96xf32>
    %19 = math.exp %18 : vector<2x96xf32>
    %cst_20 = arith.constant 1.000000e+00 : f32
    %20 = vector.broadcast %cst_20 : f32 to vector<2x96xf32>
    %21 = arith.addf %20, %19 : vector<2x96xf32>
    %22 = arith.divf %20, %21 : vector<2x96xf32>
    %23 = vector.extract_strided_slice %16 {offsets = [0, 96], sizes = [2, 32], strides = [1, 1]} : vector<2x128xf32> to vector<2x32xf32>
    %24 = math.tanh %23 : vector<2x32xf32>
    %25 = vector.extract_strided_slice %22 {offsets = [0, 0], sizes = [2, 32], strides = [1, 1]} : vector<2x96xf32> to vector<2x32xf32>
    %26 = vector.extract_strided_slice %22 {offsets = [0, 32], sizes = [2, 32], strides = [1, 1]} : vector<2x96xf32> to vector<2x32xf32>
    %27 = vector.extract_strided_slice %22 {offsets = [0, 64], sizes = [2, 32], strides = [1, 1]} : vector<2x96xf32> to vector<2x32xf32>
    %28 = arith.mulf %26, %13 : vector<2x32xf32>
    %29 = arith.mulf %25, %24 : vector<2x32xf32>
    %30 = arith.addf %28, %29 : vector<2x32xf32>
    %31 = math.tanh %30 : vector<2x32xf32>
    %32 = arith.mulf %27, %31 : vector<2x32xf32>
    %c0_21 = arith.constant 0 : index
    %c0_22 = arith.constant 0 : index
    %33 = vector.load %arg12[%c0_21, %c0_22] : memref<16x32xf32, #tpu.memory_space<vmem>>, vector<2x32xf32>
    tpu.vector_store %arg12[%c0_21, %c0_22], %32 {strides = array<i32>} : memref<16x32xf32, #tpu.memory_space<vmem>>, vector<2x32xf32>,
    %c2 = arith.constant 2 : index
    %c0_23 = arith.constant 0 : index
    %34 = vector.load %arg13[%c2, %c0_23] : memref<16x128xf32, #tpu.memory_space<vmem>>, vector<2x128xf32>
    %cst_24 = arith.constant dense<0.000000e+00> : vector<2x128xf32>
    %35 = tpu.matmul %32, %1, %cst_24 {dimension_numbers = #tpu.dot_dimension_numbers<[1], [0], [0], [1], [0, 0, 1, 1], [], []>} : vector<2x32xf32>, vector<32x128xf32>, vector<2x128xf32> -> vector<2x128xf32>
    %36 = arith.addf %34, %35 : vector<2x128xf32>
    %37 = vector.extract_strided_slice %36 {offsets = [0, 0], sizes = [2, 96], strides = [1, 1]} : vector<2x128xf32> to vector<2x96xf32>
    %38 = arith.negf %37 : vector<2x96xf32>
    %39 = math.exp %38 : vector<2x96xf32>
    %cst_25 = arith.constant 1.000000e+00 : f32
    %40 = vector.broadcast %cst_25 : f32 to vector<2x96xf32>
    %41 = arith.addf %40, %39 : vector<2x96xf32>
    %42 = arith.divf %40, %41 : vector<2x96xf32>
    %43 = vector.extract_strided_slice %36 {offsets = [0, 96], sizes = [2, 32], strides = [1, 1]} : vector<2x128xf32> to vector<2x32xf32>
    %44 = math.tanh %43 : vector<2x32xf32>
    %45 = vector.extract_strided_slice %42 {offsets = [0, 0], sizes = [2, 32], strides = [1, 1]} : vector<2x96xf32> to vector<2x32xf32>
    %46 = vector.extract_strided_slice %42 {offsets = [0, 32], sizes = [2, 32], strides = [1, 1]} : vector<2x96xf32> to vector<2x32xf32>
    %47 = vector.extract_strided_slice %42 {offsets = [0, 64], sizes = [2, 32], strides = [1, 1]} : vector<2x96xf32> to vector<2x32xf32>
    %48 = arith.mulf %46, %30 : vector<2x32xf32>
    %49 = arith.mulf %45, %44 : vector<2x32xf32>
    %50 = arith.addf %48, %49 : vector<2x32xf32>
    %51 = math.tanh %50 : vector<2x32xf32>
    %52 = arith.mulf %47, %51 : vector<2x32xf32>
    %c2_26 = arith.constant 2 : index
    %c0_27 = arith.constant 0 : index
    %53 = vector.load %arg12[%c2_26, %c0_27] : memref<16x32xf32, #tpu.memory_space<vmem>>, vector<2x32xf32>
    tpu.vector_store %arg12[%c2_26, %c0_27], %52 {strides = array<i32>} : memref<16x32xf32, #tpu.memory_space<vmem>>, vector<2x32xf32>,
    %c4 = arith.constant 4 : index
    %c0_28 = arith.constant 0 : index
    %54 = vector.load %arg13[%c4, %c0_28] : memref<16x128xf32, #tpu.memory_space<vmem>>, vector<2x128xf32>
    %cst_29 = arith.constant dense<0.000000e+00> : vector<2x128xf32>
    %55 = tpu.matmul %52, %1, %cst_29 {dimension_numbers = #tpu.dot_dimension_numbers<[1], [0], [0], [1], [0, 0, 1, 1], [], []>} : vector<2x32xf32>, vector<32x128xf32>, vector<2x128xf32> -> vector<2x128xf32>
    %56 = arith.addf %54, %55 : vector<2x128xf32>
    %57 = vector.extract_strided_slice %56 {offsets = [0, 0], sizes = [2, 96], strides = [1, 1]} : vector<2x128xf32> to vector<2x96xf32>
    %58 = arith.negf %57 : vector<2x96xf32>
    %59 = math.exp %58 : vector<2x96xf32>
    %cst_30 = arith.constant 1.000000e+00 : f32
    %60 = vector.broadcast %cst_30 : f32 to vector<2x96xf32>
    %61 = arith.addf %60, %59 : vector<2x96xf32>
    %62 = arith.divf %60, %61 : vector<2x96xf32>
    %63 = vector.extract_strided_slice %56 {offsets = [0, 96], sizes = [2, 32], strides = [1, 1]} : vector<2x128xf32> to vector<2x32xf32>
    %64 = math.tanh %63 : vector<2x32xf32>
    %65 = vector.extract_strided_slice %62 {offsets = [0, 0], sizes = [2, 32], strides = [1, 1]} : vector<2x96xf32> to vector<2x32xf32>
    %66 = vector.extract_strided_slice %62 {offsets = [0, 32], sizes = [2, 32], strides = [1, 1]} : vector<2x96xf32> to vector<2x32xf32>
    %67 = vector.extract_strided_slice %62 {offsets = [0, 64], sizes = [2, 32], strides = [1, 1]} : vector<2x96xf32> to vector<2x32xf32>
    %68 = arith.mulf %66, %50 : vector<2x32xf32>
    %69 = arith.mulf %65, %64 : vector<2x32xf32>
    %70 = arith.addf %68, %69 : vector<2x32xf32>
    %71 = math.tanh %70 : vector<2x32xf32>
    %72 = arith.mulf %67, %71 : vector<2x32xf32>
    %c4_31 = arith.constant 4 : index
    %c0_32 = arith.constant 0 : index
    %73 = vector.load %arg12[%c4_31, %c0_32] : memref<16x32xf32, #tpu.memory_space<vmem>>, vector<2x32xf32>
    tpu.vector_store %arg12[%c4_31, %c0_32], %72 {strides = array<i32>} : memref<16x32xf32, #tpu.memory_space<vmem>>, vector<2x32xf32>,
    %c6 = arith.constant 6 : index
    %c0_33 = arith.constant 0 : index
    %74 = vector.load %arg13[%c6, %c0_33] : memref<16x128xf32, #tpu.memory_space<vmem>>, vector<2x128xf32>
    %cst_34 = arith.constant dense<0.000000e+00> : vector<2x128xf32>
    %75 = tpu.matmul %72, %1, %cst_34 {dimension_numbers = #tpu.dot_dimension_numbers<[1], [0], [0], [1], [0, 0, 1, 1], [], []>} : vector<2x32xf32>, vector<32x128xf32>, vector<2x128xf32> -> vector<2x128xf32>
    %76 = arith.addf %74, %75 : vector<2x128xf32>
    %77 = vector.extract_strided_slice %76 {offsets = [0, 0], sizes = [2, 96], strides = [1, 1]} : vector<2x128xf32> to vector<2x96xf32>
    %78 = arith.negf %77 : vector<2x96xf32>
    %79 = math.exp %78 : vector<2x96xf32>
    %cst_35 = arith.constant 1.000000e+00 : f32
    %80 = vector.broadcast %cst_35 : f32 to vector<2x96xf32>
    %81 = arith.addf %80, %79 : vector<2x96xf32>
    %82 = arith.divf %80, %81 : vector<2x96xf32>
    %83 = vector.extract_strided_slice %76 {offsets = [0, 96], sizes = [2, 32], strides = [1, 1]} : vector<2x128xf32> to vector<2x32xf32>
    %84 = math.tanh %83 : vector<2x32xf32>
    %85 = vector.extract_strided_slice %82 {offsets = [0, 0], sizes = [2, 32], strides = [1, 1]} : vector<2x96xf32> to vector<2x32xf32>
    %86 = vector.extract_strided_slice %82 {offsets = [0, 32], sizes = [2, 32], strides = [1, 1]} : vector<2x96xf32> to vector<2x32xf32>
    %87 = vector.extract_strided_slice %82 {offsets = [0, 64], sizes = [2, 32], strides = [1, 1]} : vector<2x96xf32> to vector<2x32xf32>
    %88 = arith.mulf %86, %70 : vector<2x32xf32>
    %89 = arith.mulf %85, %84 : vector<2x32xf32>
    %90 = arith.addf %88, %89 : vector<2x32xf32>
    %91 = math.tanh %90 : vector<2x32xf32>
    %92 = arith.mulf %87, %91 : vector<2x32xf32>
    %c6_36 = arith.constant 6 : index
    %c0_37 = arith.constant 0 : index
    %93 = vector.load %arg12[%c6_36, %c0_37] : memref<16x32xf32, #tpu.memory_space<vmem>>, vector<2x32xf32>
    tpu.vector_store %arg12[%c6_36, %c0_37], %92 {strides = array<i32>} : memref<16x32xf32, #tpu.memory_space<vmem>>, vector<2x32xf32>,
    %c8 = arith.constant 8 : index
    %c0_38 = arith.constant 0 : index
    %94 = vector.load %arg13[%c8, %c0_38] : memref<16x128xf32, #tpu.memory_space<vmem>>, vector<2x128xf32>
    %cst_39 = arith.constant dense<0.000000e+00> : vector<2x128xf32>
    %95 = tpu.matmul %92, %1, %cst_39 {dimension_numbers = #tpu.dot_dimension_numbers<[1], [0], [0], [1], [0, 0, 1, 1], [], []>} : vector<2x32xf32>, vector<32x128xf32>, vector<2x128xf32> -> vector<2x128xf32>
    %96 = arith.addf %94, %95 : vector<2x128xf32>
    %97 = vector.extract_strided_slice %96 {offsets = [0, 0], sizes = [2, 96], strides = [1, 1]} : vector<2x128xf32> to vector<2x96xf32>
    %98 = arith.negf %97 : vector<2x96xf32>
    %99 = math.exp %98 : vector<2x96xf32>
    %cst_40 = arith.constant 1.000000e+00 : f32
    %100 = vector.broadcast %cst_40 : f32 to vector<2x96xf32>
    %101 = arith.addf %100, %99 : vector<2x96xf32>
    %102 = arith.divf %100, %101 : vector<2x96xf32>
    %103 = vector.extract_strided_slice %96 {offsets = [0, 96], sizes = [2, 32], strides = [1, 1]} : vector<2x128xf32> to vector<2x32xf32>
    %104 = math.tanh %103 : vector<2x32xf32>
    %105 = vector.extract_strided_slice %102 {offsets = [0, 0], sizes = [2, 32], strides = [1, 1]} : vector<2x96xf32> to vector<2x32xf32>
    %106 = vector.extract_strided_slice %102 {offsets = [0, 32], sizes = [2, 32], strides = [1, 1]} : vector<2x96xf32> to vector<2x32xf32>
    %107 = vector.extract_strided_slice %102 {offsets = [0, 64], sizes = [2, 32], strides = [1, 1]} : vector<2x96xf32> to vector<2x32xf32>
    %108 = arith.mulf %106, %90 : vector<2x32xf32>
    %109 = arith.mulf %105, %104 : vector<2x32xf32>
    %110 = arith.addf %108, %109 : vector<2x32xf32>
    %111 = math.tanh %110 : vector<2x32xf32>
    %112 = arith.mulf %107, %111 : vector<2x32xf32>
    %c8_41 = arith.constant 8 : index
    %c0_42 = arith.constant 0 : index
    %113 = vector.load %arg12[%c8_41, %c0_42] : memref<16x32xf32, #tpu.memory_space<vmem>>, vector<2x32xf32>
    tpu.vector_store %arg12[%c8_41, %c0_42], %112 {strides = array<i32>} : memref<16x32xf32, #tpu.memory_space<vmem>>, vector<2x32xf32>,
    %c10 = arith.constant 10 : index
    %c0_43 = arith.constant 0 : index
    %114 = vector.load %arg13[%c10, %c0_43] : memref<16x128xf32, #tpu.memory_space<vmem>>, vector<2x128xf32>
    %cst_44 = arith.constant dense<0.000000e+00> : vector<2x128xf32>
    %115 = tpu.matmul %112, %1, %cst_44 {dimension_numbers = #tpu.dot_dimension_numbers<[1], [0], [0], [1], [0, 0, 1, 1], [], []>} : vector<2x32xf32>, vector<32x128xf32>, vector<2x128xf32> -> vector<2x128xf32>
    %116 = arith.addf %114, %115 : vector<2x128xf32>
    %117 = vector.extract_strided_slice %116 {offsets = [0, 0], sizes = [2, 96], strides = [1, 1]} : vector<2x128xf32> to vector<2x96xf32>
    %118 = arith.negf %117 : vector<2x96xf32>
    %119 = math.exp %118 : vector<2x96xf32>
    %cst_45 = arith.constant 1.000000e+00 : f32
    %120 = vector.broadcast %cst_45 : f32 to vector<2x96xf32>
    %121 = arith.addf %120, %119 : vector<2x96xf32>
    %122 = arith.divf %120, %121 : vector<2x96xf32>
    %123 = vector.extract_strided_slice %116 {offsets = [0, 96], sizes = [2, 32], strides = [1, 1]} : vector<2x128xf32> to vector<2x32xf32>
    %124 = math.tanh %123 : vector<2x32xf32>
    %125 = vector.extract_strided_slice %122 {offsets = [0, 0], sizes = [2, 32], strides = [1, 1]} : vector<2x96xf32> to vector<2x32xf32>
    %126 = vector.extract_strided_slice %122 {offsets = [0, 32], sizes = [2, 32], strides = [1, 1]} : vector<2x96xf32> to vector<2x32xf32>
    %127 = vector.extract_strided_slice %122 {offsets = [0, 64], sizes = [2, 32], strides = [1, 1]} : vector<2x96xf32> to vector<2x32xf32>
    %128 = arith.mulf %126, %110 : vector<2x32xf32>
    %129 = arith.mulf %125, %124 : vector<2x32xf32>
    %130 = arith.addf %128, %129 : vector<2x32xf32>
    %131 = math.tanh %130 : vector<2x32xf32>
    %132 = arith.mulf %127, %131 : vector<2x32xf32>
    %c10_46 = arith.constant 10 : index
    %c0_47 = arith.constant 0 : index
    %133 = vector.load %arg12[%c10_46, %c0_47] : memref<16x32xf32, #tpu.memory_space<vmem>>, vector<2x32xf32>
    tpu.vector_store %arg12[%c10_46, %c0_47], %132 {strides = array<i32>} : memref<16x32xf32, #tpu.memory_space<vmem>>, vector<2x32xf32>,
    %c12 = arith.constant 12 : index
    %c0_48 = arith.constant 0 : index
    %134 = vector.load %arg13[%c12, %c0_48] : memref<16x128xf32, #tpu.memory_space<vmem>>, vector<2x128xf32>
    %cst_49 = arith.constant dense<0.000000e+00> : vector<2x128xf32>
    %135 = tpu.matmul %132, %1, %cst_49 {dimension_numbers = #tpu.dot_dimension_numbers<[1], [0], [0], [1], [0, 0, 1, 1], [], []>} : vector<2x32xf32>, vector<32x128xf32>, vector<2x128xf32> -> vector<2x128xf32>
    %136 = arith.addf %134, %135 : vector<2x128xf32>
    %137 = vector.extract_strided_slice %136 {offsets = [0, 0], sizes = [2, 96], strides = [1, 1]} : vector<2x128xf32> to vector<2x96xf32>
    %138 = arith.negf %137 : vector<2x96xf32>
    %139 = math.exp %138 : vector<2x96xf32>
    %cst_50 = arith.constant 1.000000e+00 : f32
    %140 = vector.broadcast %cst_50 : f32 to vector<2x96xf32>
    %141 = arith.addf %140, %139 : vector<2x96xf32>
    %142 = arith.divf %140, %141 : vector<2x96xf32>
    %143 = vector.extract_strided_slice %136 {offsets = [0, 96], sizes = [2, 32], strides = [1, 1]} : vector<2x128xf32> to vector<2x32xf32>
    %144 = math.tanh %143 : vector<2x32xf32>
    %145 = vector.extract_strided_slice %142 {offsets = [0, 0], sizes = [2, 32], strides = [1, 1]} : vector<2x96xf32> to vector<2x32xf32>
    %146 = vector.extract_strided_slice %142 {offsets = [0, 32], sizes = [2, 32], strides = [1, 1]} : vector<2x96xf32> to vector<2x32xf32>
    %147 = vector.extract_strided_slice %142 {offsets = [0, 64], sizes = [2, 32], strides = [1, 1]} : vector<2x96xf32> to vector<2x32xf32>
    %148 = arith.mulf %146, %130 : vector<2x32xf32>
    %149 = arith.mulf %145, %144 : vector<2x32xf32>
    %150 = arith.addf %148, %149 : vector<2x32xf32>
    %151 = math.tanh %150 : vector<2x32xf32>
    %152 = arith.mulf %147, %151 : vector<2x32xf32>
    %c12_51 = arith.constant 12 : index
    %c0_52 = arith.constant 0 : index
    %153 = vector.load %arg12[%c12_51, %c0_52] : memref<16x32xf32, #tpu.memory_space<vmem>>, vector<2x32xf32>
    tpu.vector_store %arg12[%c12_51, %c0_52], %152 {strides = array<i32>} : memref<16x32xf32, #tpu.memory_space<vmem>>, vector<2x32xf32>,
    %c14 = arith.constant 14 : index
    %c0_53 = arith.constant 0 : index
    %154 = vector.load %arg13[%c14, %c0_53] : memref<16x128xf32, #tpu.memory_space<vmem>>, vector<2x128xf32>
    %cst_54 = arith.constant dense<0.000000e+00> : vector<2x128xf32>
    %155 = tpu.matmul %152, %1, %cst_54 {dimension_numbers = #tpu.dot_dimension_numbers<[1], [0], [0], [1], [0, 0, 1, 1], [], []>} : vector<2x32xf32>, vector<32x128xf32>, vector<2x128xf32> -> vector<2x128xf32>
    %156 = arith.addf %154, %155 : vector<2x128xf32>
    %157 = vector.extract_strided_slice %156 {offsets = [0, 0], sizes = [2, 96], strides = [1, 1]} : vector<2x128xf32> to vector<2x96xf32>
    %158 = arith.negf %157 : vector<2x96xf32>
    %159 = math.exp %158 : vector<2x96xf32>
    %cst_55 = arith.constant 1.000000e+00 : f32
    %160 = vector.broadcast %cst_55 : f32 to vector<2x96xf32>
    %161 = arith.addf %160, %159 : vector<2x96xf32>
    %162 = arith.divf %160, %161 : vector<2x96xf32>
    %163 = vector.extract_strided_slice %156 {offsets = [0, 96], sizes = [2, 32], strides = [1, 1]} : vector<2x128xf32> to vector<2x32xf32>
    %164 = math.tanh %163 : vector<2x32xf32>
    %165 = vector.extract_strided_slice %162 {offsets = [0, 0], sizes = [2, 32], strides = [1, 1]} : vector<2x96xf32> to vector<2x32xf32>
    %166 = vector.extract_strided_slice %162 {offsets = [0, 32], sizes = [2, 32], strides = [1, 1]} : vector<2x96xf32> to vector<2x32xf32>
    %167 = vector.extract_strided_slice %162 {offsets = [0, 64], sizes = [2, 32], strides = [1, 1]} : vector<2x96xf32> to vector<2x32xf32>
    %168 = arith.mulf %166, %150 : vector<2x32xf32>
    %169 = arith.mulf %165, %164 : vector<2x32xf32>
    %170 = arith.addf %168, %169 : vector<2x32xf32>
    %171 = math.tanh %170 : vector<2x32xf32>
    %172 = arith.mulf %167, %171 : vector<2x32xf32>
    %c14_56 = arith.constant 14 : index
    %c0_57 = arith.constant 0 : index
    %173 = vector.load %arg12[%c14_56, %c0_57] : memref<16x32xf32, #tpu.memory_space<vmem>>, vector<2x32xf32>
    tpu.vector_store %arg12[%c14_56, %c0_57], %172 {strides = array<i32>} : memref<16x32xf32, #tpu.memory_space<vmem>>, vector<2x32xf32>,
    %c0_58 = arith.constant 0 : index
    %c0_59 = arith.constant 0 : index
    %c0_60 = arith.constant 0 : index
    %174 = vector.load %arg10[%c0_58, %c0_59, %c0_60] : memref<2x2x32xf32, #tpu.memory_space<vmem>>, vector<1x2x32xf32>
    %175 = vector.shape_cast %174 : vector<1x2x32xf32> to vector<2x32xf32>
    %176 = vector.shape_cast %172 : vector<2x32xf32> to vector<1x2x32xf32>
    tpu.vector_store %arg10[%c0_58, %c0_59, %c0_60], %176 {strides = array<i32>} : memref<2x2x32xf32, #tpu.memory_space<vmem>>, vector<1x2x32xf32>,
    %c0_61 = arith.constant 0 : index
    %c0_62 = arith.constant 0 : index
    %c0_63 = arith.constant 0 : index
    %177 = vector.load %arg11[%c0_61, %c0_62, %c0_63] : memref<2x2x32xf32, #tpu.memory_space<vmem>>, vector<1x2x32xf32>
    %178 = vector.shape_cast %177 : vector<1x2x32xf32> to vector<2x32xf32>
    %179 = vector.shape_cast %170 : vector<2x32xf32> to vector<1x2x32xf32>
    tpu.vector_store %arg11[%c0_61, %c0_62, %c0_63], %179 {strides = array<i32>} : memref<2x2x32xf32, #tpu.memory_space<vmem>>, vector<1x2x32xf32>,
    %c1 = arith.constant 1 : index
    %c0_64 = arith.constant 0 : index
    %c0_65 = arith.constant 0 : index
    %180 = vector.load %arg5[%c1, %c0_64, %c0_65] : memref<2x32x128xf32, #tpu.memory_space<vmem>>, vector<1x32x128xf32>
    %181 = vector.shape_cast %180 : vector<1x32x128xf32> to vector<32x128xf32>
    %c1_66 = arith.constant 1 : index
    %c0_67 = arith.constant 0 : index
    %c0_68 = arith.constant 0 : index
    %182 = vector.load %arg6[%c1_66, %c0_67, %c0_68] : memref<2x1x128xf32, #tpu.memory_space<vmem>>, vector<1x1x128xf32>
    %183 = vector.shape_cast %182 : vector<1x1x128xf32> to vector<1x128xf32>
    %c0_69 = arith.constant 0 : index
    %c0_70 = arith.constant 0 : index
    %184 = vector.load %arg12[%c0_69, %c0_70] : memref<16x32xf32, #tpu.memory_space<vmem>>, vector<16x32xf32>
    %c0_71 = arith.constant 0 : index
    %c0_72 = arith.constant 0 : index
    %c0_73 = arith.constant 0 : index
    %185 = vector.load %arg4[%c0_71, %c0_72, %c0_73] : memref<1x32x128xf32, #tpu.memory_space<vmem>>, vector<1x32x128xf32>
    %186 = vector.shape_cast %185 : vector<1x32x128xf32> to vector<32x128xf32>
    %cst_74 = arith.constant dense<0.000000e+00> : vector<16x128xf32>
    %187 = tpu.matmul %184, %186, %cst_74 {dimension_numbers = #tpu.dot_dimension_numbers<[1], [0], [0], [1], [0, 0, 1, 1], [], []>} : vector<16x32xf32>, vector<32x128xf32>, vector<16x128xf32> -> vector<16x128xf32>
    %188 = vector.broadcast %183 : vector<1x128xf32> to vector<16x128xf32>
    %189 = arith.addf %187, %188 : vector<16x128xf32>
    %c0_75 = arith.constant 0 : index
    %c0_76 = arith.constant 0 : index
    %190 = vector.load %arg13[%c0_75, %c0_76] : memref<16x128xf32, #tpu.memory_space<vmem>>, vector<16x128xf32>
    tpu.vector_store %arg13[%c0_75, %c0_76], %189 {strides = array<i32>} : memref<16x128xf32, #tpu.memory_space<vmem>>, vector<16x128xf32>,
    %c1_77 = arith.constant 1 : index
    %c0_78 = arith.constant 0 : index
    %c0_79 = arith.constant 0 : index
    %191 = vector.load %arg1[%c1_77, %c0_78, %c0_79] : memref<2x2x32xf32, #tpu.memory_space<vmem>>, vector<1x2x32xf32>
    %192 = vector.shape_cast %191 : vector<1x2x32xf32> to vector<2x32xf32>
    %c1_80 = arith.constant 1 : index
    %c0_81 = arith.constant 0 : index
    %c0_82 = arith.constant 0 : index
    %193 = vector.load %arg2[%c1_80, %c0_81, %c0_82] : memref<2x2x32xf32, #tpu.memory_space<vmem>>, vector<1x2x32xf32>
    %194 = vector.shape_cast %193 : vector<1x2x32xf32> to vector<2x32xf32>
    %c0_83 = arith.constant 0 : index
    %c0_84 = arith.constant 0 : index
    %195 = vector.load %arg13[%c0_83, %c0_84] : memref<16x128xf32, #tpu.memory_space<vmem>>, vector<2x128xf32>
    %cst_85 = arith.constant dense<0.000000e+00> : vector<2x128xf32>
    %196 = tpu.matmul %192, %181, %cst_85 {dimension_numbers = #tpu.dot_dimension_numbers<[1], [0], [0], [1], [0, 0, 1, 1], [], []>} : vector<2x32xf32>, vector<32x128xf32>, vector<2x128xf32> -> vector<2x128xf32>
    %197 = arith.addf %195, %196 : vector<2x128xf32>
    %198 = vector.extract_strided_slice %197 {offsets = [0, 0], sizes = [2, 96], strides = [1, 1]} : vector<2x128xf32> to vector<2x96xf32>
    %199 = arith.negf %198 : vector<2x96xf32>
    %200 = math.exp %199 : vector<2x96xf32>
    %cst_86 = arith.constant 1.000000e+00 : f32
    %201 = vector.broadcast %cst_86 : f32 to vector<2x96xf32>
    %202 = arith.addf %201, %200 : vector<2x96xf32>
    %203 = arith.divf %201, %202 : vector<2x96xf32>
    %204 = vector.extract_strided_slice %197 {offsets = [0, 96], sizes = [2, 32], strides = [1, 1]} : vector<2x128xf32> to vector<2x32xf32>
    %205 = math.tanh %204 : vector<2x32xf32>
    %206 = vector.extract_strided_slice %203 {offsets = [0, 0], sizes = [2, 32], strides = [1, 1]} : vector<2x96xf32> to vector<2x32xf32>
    %207 = vector.extract_strided_slice %203 {offsets = [0, 32], sizes = [2, 32], strides = [1, 1]} : vector<2x96xf32> to vector<2x32xf32>
    %208 = vector.extract_strided_slice %203 {offsets = [0, 64], sizes = [2, 32], strides = [1, 1]} : vector<2x96xf32> to vector<2x32xf32>
    %209 = arith.mulf %207, %194 : vector<2x32xf32>
    %210 = arith.mulf %206, %205 : vector<2x32xf32>
    %211 = arith.addf %209, %210 : vector<2x32xf32>
    %212 = math.tanh %211 : vector<2x32xf32>
    %213 = arith.mulf %208, %212 : vector<2x32xf32>
    %c0_87 = arith.constant 0 : index
    %c0_88 = arith.constant 0 : index
    %214 = vector.load %arg12[%c0_87, %c0_88] : memref<16x32xf32, #tpu.memory_space<vmem>>, vector<2x32xf32>
    tpu.vector_store %arg12[%c0_87, %c0_88], %213 {strides = array<i32>} : memref<16x32xf32, #tpu.memory_space<vmem>>, vector<2x32xf32>,
    %c2_89 = arith.constant 2 : index
    %c0_90 = arith.constant 0 : index
    %215 = vector.load %arg13[%c2_89, %c0_90] : memref<16x128xf32, #tpu.memory_space<vmem>>, vector<2x128xf32>
    %cst_91 = arith.constant dense<0.000000e+00> : vector<2x128xf32>
    %216 = tpu.matmul %213, %181, %cst_91 {dimension_numbers = #tpu.dot_dimension_numbers<[1], [0], [0], [1], [0, 0, 1, 1], [], []>} : vector<2x32xf32>, vector<32x128xf32>, vector<2x128xf32> -> vector<2x128xf32>
    %217 = arith.addf %215, %216 : vector<2x128xf32>
    %218 = vector.extract_strided_slice %217 {offsets = [0, 0], sizes = [2, 96], strides = [1, 1]} : vector<2x128xf32> to vector<2x96xf32>
    %219 = arith.negf %218 : vector<2x96xf32>
    %220 = math.exp %219 : vector<2x96xf32>
    %cst_92 = arith.constant 1.000000e+00 : f32
    %221 = vector.broadcast %cst_92 : f32 to vector<2x96xf32>
    %222 = arith.addf %221, %220 : vector<2x96xf32>
    %223 = arith.divf %221, %222 : vector<2x96xf32>
    %224 = vector.extract_strided_slice %217 {offsets = [0, 96], sizes = [2, 32], strides = [1, 1]} : vector<2x128xf32> to vector<2x32xf32>
    %225 = math.tanh %224 : vector<2x32xf32>
    %226 = vector.extract_strided_slice %223 {offsets = [0, 0], sizes = [2, 32], strides = [1, 1]} : vector<2x96xf32> to vector<2x32xf32>
    %227 = vector.extract_strided_slice %223 {offsets = [0, 32], sizes = [2, 32], strides = [1, 1]} : vector<2x96xf32> to vector<2x32xf32>
    %228 = vector.extract_strided_slice %223 {offsets = [0, 64], sizes = [2, 32], strides = [1, 1]} : vector<2x96xf32> to vector<2x32xf32>
    %229 = arith.mulf %227, %211 : vector<2x32xf32>
    %230 = arith.mulf %226, %225 : vector<2x32xf32>
    %231 = arith.addf %229, %230 : vector<2x32xf32>
    %232 = math.tanh %231 : vector<2x32xf32>
    %233 = arith.mulf %228, %232 : vector<2x32xf32>
    %c2_93 = arith.constant 2 : index
    %c0_94 = arith.constant 0 : index
    %234 = vector.load %arg12[%c2_93, %c0_94] : memref<16x32xf32, #tpu.memory_space<vmem>>, vector<2x32xf32>
    tpu.vector_store %arg12[%c2_93, %c0_94], %233 {strides = array<i32>} : memref<16x32xf32, #tpu.memory_space<vmem>>, vector<2x32xf32>,
    %c4_95 = arith.constant 4 : index
    %c0_96 = arith.constant 0 : index
    %235 = vector.load %arg13[%c4_95, %c0_96] : memref<16x128xf32, #tpu.memory_space<vmem>>, vector<2x128xf32>
    %cst_97 = arith.constant dense<0.000000e+00> : vector<2x128xf32>
    %236 = tpu.matmul %233, %181, %cst_97 {dimension_numbers = #tpu.dot_dimension_numbers<[1], [0], [0], [1], [0, 0, 1, 1], [], []>} : vector<2x32xf32>, vector<32x128xf32>, vector<2x128xf32> -> vector<2x128xf32>
    %237 = arith.addf %235, %236 : vector<2x128xf32>
    %238 = vector.extract_strided_slice %237 {offsets = [0, 0], sizes = [2, 96], strides = [1, 1]} : vector<2x128xf32> to vector<2x96xf32>
    %239 = arith.negf %238 : vector<2x96xf32>
    %240 = math.exp %239 : vector<2x96xf32>
    %cst_98 = arith.constant 1.000000e+00 : f32
    %241 = vector.broadcast %cst_98 : f32 to vector<2x96xf32>
    %242 = arith.addf %241, %240 : vector<2x96xf32>
    %243 = arith.divf %241, %242 : vector<2x96xf32>
    %244 = vector.extract_strided_slice %237 {offsets = [0, 96], sizes = [2, 32], strides = [1, 1]} : vector<2x128xf32> to vector<2x32xf32>
    %245 = math.tanh %244 : vector<2x32xf32>
    %246 = vector.extract_strided_slice %243 {offsets = [0, 0], sizes = [2, 32], strides = [1, 1]} : vector<2x96xf32> to vector<2x32xf32>
    %247 = vector.extract_strided_slice %243 {offsets = [0, 32], sizes = [2, 32], strides = [1, 1]} : vector<2x96xf32> to vector<2x32xf32>
    %248 = vector.extract_strided_slice %243 {offsets = [0, 64], sizes = [2, 32], strides = [1, 1]} : vector<2x96xf32> to vector<2x32xf32>
    %249 = arith.mulf %247, %231 : vector<2x32xf32>
    %250 = arith.mulf %246, %245 : vector<2x32xf32>
    %251 = arith.addf %249, %250 : vector<2x32xf32>
    %252 = math.tanh %251 : vector<2x32xf32>
    %253 = arith.mulf %248, %252 : vector<2x32xf32>
    %c4_99 = arith.constant 4 : index
    %c0_100 = arith.constant 0 : index
    %254 = vector.load %arg12[%c4_99, %c0_100] : memref<16x32xf32, #tpu.memory_space<vmem>>, vector<2x32xf32>
    tpu.vector_store %arg12[%c4_99, %c0_100], %253 {strides = array<i32>} : memref<16x32xf32, #tpu.memory_space<vmem>>, vector<2x32xf32>,
    %c6_101 = arith.constant 6 : index
    %c0_102 = arith.constant 0 : index
    %255 = vector.load %arg13[%c6_101, %c0_102] : memref<16x128xf32, #tpu.memory_space<vmem>>, vector<2x128xf32>
    %cst_103 = arith.constant dense<0.000000e+00> : vector<2x128xf32>
    %256 = tpu.matmul %253, %181, %cst_103 {dimension_numbers = #tpu.dot_dimension_numbers<[1], [0], [0], [1], [0, 0, 1, 1], [], []>} : vector<2x32xf32>, vector<32x128xf32>, vector<2x128xf32> -> vector<2x128xf32>
    %257 = arith.addf %255, %256 : vector<2x128xf32>
    %258 = vector.extract_strided_slice %257 {offsets = [0, 0], sizes = [2, 96], strides = [1, 1]} : vector<2x128xf32> to vector<2x96xf32>
    %259 = arith.negf %258 : vector<2x96xf32>
    %260 = math.exp %259 : vector<2x96xf32>
    %cst_104 = arith.constant 1.000000e+00 : f32
    %261 = vector.broadcast %cst_104 : f32 to vector<2x96xf32>
    %262 = arith.addf %261, %260 : vector<2x96xf32>
    %263 = arith.divf %261, %262 : vector<2x96xf32>
    %264 = vector.extract_strided_slice %257 {offsets = [0, 96], sizes = [2, 32], strides = [1, 1]} : vector<2x128xf32> to vector<2x32xf32>
    %265 = math.tanh %264 : vector<2x32xf32>
    %266 = vector.extract_strided_slice %263 {offsets = [0, 0], sizes = [2, 32], strides = [1, 1]} : vector<2x96xf32> to vector<2x32xf32>
    %267 = vector.extract_strided_slice %263 {offsets = [0, 32], sizes = [2, 32], strides = [1, 1]} : vector<2x96xf32> to vector<2x32xf32>
    %268 = vector.extract_strided_slice %263 {offsets = [0, 64], sizes = [2, 32], strides = [1, 1]} : vector<2x96xf32> to vector<2x32xf32>
    %269 = arith.mulf %267, %251 : vector<2x32xf32>
    %270 = arith.mulf %266, %265 : vector<2x32xf32>
    %271 = arith.addf %269, %270 : vector<2x32xf32>
    %272 = math.tanh %271 : vector<2x32xf32>
    %273 = arith.mulf %268, %272 : vector<2x32xf32>
    %c6_105 = arith.constant 6 : index
    %c0_106 = arith.constant 0 : index
    %274 = vector.load %arg12[%c6_105, %c0_106] : memref<16x32xf32, #tpu.memory_space<vmem>>, vector<2x32xf32>
    tpu.vector_store %arg12[%c6_105, %c0_106], %273 {strides = array<i32>} : memref<16x32xf32, #tpu.memory_space<vmem>>, vector<2x32xf32>,
    %c8_107 = arith.constant 8 : index
    %c0_108 = arith.constant 0 : index
    %275 = vector.load %arg13[%c8_107, %c0_108] : memref<16x128xf32, #tpu.memory_space<vmem>>, vector<2x128xf32>
    %cst_109 = arith.constant dense<0.000000e+00> : vector<2x128xf32>
    %276 = tpu.matmul %273, %181, %cst_109 {dimension_numbers = #tpu.dot_dimension_numbers<[1], [0], [0], [1], [0, 0, 1, 1], [], []>} : vector<2x32xf32>, vector<32x128xf32>, vector<2x128xf32> -> vector<2x128xf32>
    %277 = arith.addf %275, %276 : vector<2x128xf32>
    %278 = vector.extract_strided_slice %277 {offsets = [0, 0], sizes = [2, 96], strides = [1, 1]} : vector<2x128xf32> to vector<2x96xf32>
    %279 = arith.negf %278 : vector<2x96xf32>
    %280 = math.exp %279 : vector<2x96xf32>
    %cst_110 = arith.constant 1.000000e+00 : f32
    %281 = vector.broadcast %cst_110 : f32 to vector<2x96xf32>
    %282 = arith.addf %281, %280 : vector<2x96xf32>
    %283 = arith.divf %281, %282 : vector<2x96xf32>
    %284 = vector.extract_strided_slice %277 {offsets = [0, 96], sizes = [2, 32], strides = [1, 1]} : vector<2x128xf32> to vector<2x32xf32>
    %285 = math.tanh %284 : vector<2x32xf32>
    %286 = vector.extract_strided_slice %283 {offsets = [0, 0], sizes = [2, 32], strides = [1, 1]} : vector<2x96xf32> to vector<2x32xf32>
    %287 = vector.extract_strided_slice %283 {offsets = [0, 32], sizes = [2, 32], strides = [1, 1]} : vector<2x96xf32> to vector<2x32xf32>
    %288 = vector.extract_strided_slice %283 {offsets = [0, 64], sizes = [2, 32], strides = [1, 1]} : vector<2x96xf32> to vector<2x32xf32>
    %289 = arith.mulf %287, %271 : vector<2x32xf32>
    %290 = arith.mulf %286, %285 : vector<2x32xf32>
    %291 = arith.addf %289, %290 : vector<2x32xf32>
    %292 = math.tanh %291 : vector<2x32xf32>
    %293 = arith.mulf %288, %292 : vector<2x32xf32>
    %c8_111 = arith.constant 8 : index
    %c0_112 = arith.constant 0 : index
    %294 = vector.load %arg12[%c8_111, %c0_112] : memref<16x32xf32, #tpu.memory_space<vmem>>, vector<2x32xf32>
    tpu.vector_store %arg12[%c8_111, %c0_112], %293 {strides = array<i32>} : memref<16x32xf32, #tpu.memory_space<vmem>>, vector<2x32xf32>,
    %c10_113 = arith.constant 10 : index
    %c0_114 = arith.constant 0 : index
    %295 = vector.load %arg13[%c10_113, %c0_114] : memref<16x128xf32, #tpu.memory_space<vmem>>, vector<2x128xf32>
    %cst_115 = arith.constant dense<0.000000e+00> : vector<2x128xf32>
    %296 = tpu.matmul %293, %181, %cst_115 {dimension_numbers = #tpu.dot_dimension_numbers<[1], [0], [0], [1], [0, 0, 1, 1], [], []>} : vector<2x32xf32>, vector<32x128xf32>, vector<2x128xf32> -> vector<2x128xf32>
    %297 = arith.addf %295, %296 : vector<2x128xf32>
    %298 = vector.extract_strided_slice %297 {offsets = [0, 0], sizes = [2, 96], strides = [1, 1]} : vector<2x128xf32> to vector<2x96xf32>
    %299 = arith.negf %298 : vector<2x96xf32>
    %300 = math.exp %299 : vector<2x96xf32>
    %cst_116 = arith.constant 1.000000e+00 : f32
    %301 = vector.broadcast %cst_116 : f32 to vector<2x96xf32>
    %302 = arith.addf %301, %300 : vector<2x96xf32>
    %303 = arith.divf %301, %302 : vector<2x96xf32>
    %304 = vector.extract_strided_slice %297 {offsets = [0, 96], sizes = [2, 32], strides = [1, 1]} : vector<2x128xf32> to vector<2x32xf32>
    %305 = math.tanh %304 : vector<2x32xf32>
    %306 = vector.extract_strided_slice %303 {offsets = [0, 0], sizes = [2, 32], strides = [1, 1]} : vector<2x96xf32> to vector<2x32xf32>
    %307 = vector.extract_strided_slice %303 {offsets = [0, 32], sizes = [2, 32], strides = [1, 1]} : vector<2x96xf32> to vector<2x32xf32>
    %308 = vector.extract_strided_slice %303 {offsets = [0, 64], sizes = [2, 32], strides = [1, 1]} : vector<2x96xf32> to vector<2x32xf32>
    %309 = arith.mulf %307, %291 : vector<2x32xf32>
    %310 = arith.mulf %306, %305 : vector<2x32xf32>
    %311 = arith.addf %309, %310 : vector<2x32xf32>
    %312 = math.tanh %311 : vector<2x32xf32>
    %313 = arith.mulf %308, %312 : vector<2x32xf32>
    %c10_117 = arith.constant 10 : index
    %c0_118 = arith.constant 0 : index
    %314 = vector.load %arg12[%c10_117, %c0_118] : memref<16x32xf32, #tpu.memory_space<vmem>>, vector<2x32xf32>
    tpu.vector_store %arg12[%c10_117, %c0_118], %313 {strides = array<i32>} : memref<16x32xf32, #tpu.memory_space<vmem>>, vector<2x32xf32>,
    %c12_119 = arith.constant 12 : index
    %c0_120 = arith.constant 0 : index
    %315 = vector.load %arg13[%c12_119, %c0_120] : memref<16x128xf32, #tpu.memory_space<vmem>>, vector<2x128xf32>
    %cst_121 = arith.constant dense<0.000000e+00> : vector<2x128xf32>
    %316 = tpu.matmul %313, %181, %cst_121 {dimension_numbers = #tpu.dot_dimension_numbers<[1], [0], [0], [1], [0, 0, 1, 1], [], []>} : vector<2x32xf32>, vector<32x128xf32>, vector<2x128xf32> -> vector<2x128xf32>
    %317 = arith.addf %315, %316 : vector<2x128xf32>
    %318 = vector.extract_strided_slice %317 {offsets = [0, 0], sizes = [2, 96], strides = [1, 1]} : vector<2x128xf32> to vector<2x96xf32>
    %319 = arith.negf %318 : vector<2x96xf32>
    %320 = math.exp %319 : vector<2x96xf32>
    %cst_122 = arith.constant 1.000000e+00 : f32
    %321 = vector.broadcast %cst_122 : f32 to vector<2x96xf32>
    %322 = arith.addf %321, %320 : vector<2x96xf32>
    %323 = arith.divf %321, %322 : vector<2x96xf32>
    %324 = vector.extract_strided_slice %317 {offsets = [0, 96], sizes = [2, 32], strides = [1, 1]} : vector<2x128xf32> to vector<2x32xf32>
    %325 = math.tanh %324 : vector<2x32xf32>
    %326 = vector.extract_strided_slice %323 {offsets = [0, 0], sizes = [2, 32], strides = [1, 1]} : vector<2x96xf32> to vector<2x32xf32>
    %327 = vector.extract_strided_slice %323 {offsets = [0, 32], sizes = [2, 32], strides = [1, 1]} : vector<2x96xf32> to vector<2x32xf32>
    %328 = vector.extract_strided_slice %323 {offsets = [0, 64], sizes = [2, 32], strides = [1, 1]} : vector<2x96xf32> to vector<2x32xf32>
    %329 = arith.mulf %327, %311 : vector<2x32xf32>
    %330 = arith.mulf %326, %325 : vector<2x32xf32>
    %331 = arith.addf %329, %330 : vector<2x32xf32>
    %332 = math.tanh %331 : vector<2x32xf32>
    %333 = arith.mulf %328, %332 : vector<2x32xf32>
    %c12_123 = arith.constant 12 : index
    %c0_124 = arith.constant 0 : index
    %334 = vector.load %arg12[%c12_123, %c0_124] : memref<16x32xf32, #tpu.memory_space<vmem>>, vector<2x32xf32>
    tpu.vector_store %arg12[%c12_123, %c0_124], %333 {strides = array<i32>} : memref<16x32xf32, #tpu.memory_space<vmem>>, vector<2x32xf32>,
    %c14_125 = arith.constant 14 : index
    %c0_126 = arith.constant 0 : index
    %335 = vector.load %arg13[%c14_125, %c0_126] : memref<16x128xf32, #tpu.memory_space<vmem>>, vector<2x128xf32>
    %cst_127 = arith.constant dense<0.000000e+00> : vector<2x128xf32>
    %336 = tpu.matmul %333, %181, %cst_127 {dimension_numbers = #tpu.dot_dimension_numbers<[1], [0], [0], [1], [0, 0, 1, 1], [], []>} : vector<2x32xf32>, vector<32x128xf32>, vector<2x128xf32> -> vector<2x128xf32>
    %337 = arith.addf %335, %336 : vector<2x128xf32>
    %338 = vector.extract_strided_slice %337 {offsets = [0, 0], sizes = [2, 96], strides = [1, 1]} : vector<2x128xf32> to vector<2x96xf32>
    %339 = arith.negf %338 : vector<2x96xf32>
    %340 = math.exp %339 : vector<2x96xf32>
    %cst_128 = arith.constant 1.000000e+00 : f32
    %341 = vector.broadcast %cst_128 : f32 to vector<2x96xf32>
    %342 = arith.addf %341, %340 : vector<2x96xf32>
    %343 = arith.divf %341, %342 : vector<2x96xf32>
    %344 = vector.extract_strided_slice %337 {offsets = [0, 96], sizes = [2, 32], strides = [1, 1]} : vector<2x128xf32> to vector<2x32xf32>
    %345 = math.tanh %344 : vector<2x32xf32>
    %346 = vector.extract_strided_slice %343 {offsets = [0, 0], sizes = [2, 32], strides = [1, 1]} : vector<2x96xf32> to vector<2x32xf32>
    %347 = vector.extract_strided_slice %343 {offsets = [0, 32], sizes = [2, 32], strides = [1, 1]} : vector<2x96xf32> to vector<2x32xf32>
    %348 = vector.extract_strided_slice %343 {offsets = [0, 64], sizes = [2, 32], strides = [1, 1]} : vector<2x96xf32> to vector<2x32xf32>
    %349 = arith.mulf %347, %331 : vector<2x32xf32>
    %350 = arith.mulf %346, %345 : vector<2x32xf32>
    %351 = arith.addf %349, %350 : vector<2x32xf32>
    %352 = math.tanh %351 : vector<2x32xf32>
    %353 = arith.mulf %348, %352 : vector<2x32xf32>
    %c14_129 = arith.constant 14 : index
    %c0_130 = arith.constant 0 : index
    %354 = vector.load %arg12[%c14_129, %c0_130] : memref<16x32xf32, #tpu.memory_space<vmem>>, vector<2x32xf32>
    tpu.vector_store %arg12[%c14_129, %c0_130], %353 {strides = array<i32>} : memref<16x32xf32, #tpu.memory_space<vmem>>, vector<2x32xf32>,
    %c1_131 = arith.constant 1 : index
    %c0_132 = arith.constant 0 : index
    %c0_133 = arith.constant 0 : index
    %355 = vector.load %arg10[%c1_131, %c0_132, %c0_133] : memref<2x2x32xf32, #tpu.memory_space<vmem>>, vector<1x2x32xf32>
    %356 = vector.shape_cast %355 : vector<1x2x32xf32> to vector<2x32xf32>
    %357 = vector.shape_cast %353 : vector<2x32xf32> to vector<1x2x32xf32>
    tpu.vector_store %arg10[%c1_131, %c0_132, %c0_133], %357 {strides = array<i32>} : memref<2x2x32xf32, #tpu.memory_space<vmem>>, vector<1x2x32xf32>,
    %c1_134 = arith.constant 1 : index
    %c0_135 = arith.constant 0 : index
    %c0_136 = arith.constant 0 : index
    %358 = vector.load %arg11[%c1_134, %c0_135, %c0_136] : memref<2x2x32xf32, #tpu.memory_space<vmem>>, vector<1x2x32xf32>
    %359 = vector.shape_cast %358 : vector<1x2x32xf32> to vector<2x32xf32>
    %360 = vector.shape_cast %351 : vector<2x32xf32> to vector<1x2x32xf32>
    tpu.vector_store %arg11[%c1_134, %c0_135, %c0_136], %360 {strides = array<i32>} : memref<2x2x32xf32, #tpu.memory_space<vmem>>, vector<1x2x32xf32>,
    %c0_137 = arith.constant 0 : index
    %c0_138 = arith.constant 0 : index
    %361 = vector.load %arg12[%c0_137, %c0_138] : memref<16x32xf32, #tpu.memory_space<vmem>>, vector<16x32xf32>
    %c0_139 = arith.constant 0 : index
    %c0_140 = arith.constant 0 : index
    %362 = vector.load %arg7[%c0_139, %c0_140] : memref<32x128xf32, #tpu.memory_space<vmem>>, vector<32x128xf32>
    %cst_141 = arith.constant dense<0.000000e+00> : vector<16x128xf32>
    %363 = tpu.matmul %361, %362, %cst_141 {dimension_numbers = #tpu.dot_dimension_numbers<[1], [0], [0], [1], [0, 0, 1, 1], [], []>} : vector<16x32xf32>, vector<32x128xf32>, vector<16x128xf32> -> vector<16x128xf32>
    %c0_142 = arith.constant 0 : index
    %c0_143 = arith.constant 0 : index
    %364 = vector.load %arg8[%c0_142, %c0_143] : memref<1x128xf32, #tpu.memory_space<vmem>>, vector<1x128xf32>
    %365 = vector.broadcast %364 : vector<1x128xf32> to vector<16x128xf32>
    %366 = arith.addf %363, %365 : vector<16x128xf32>
    %c0_144 = arith.constant 0 : index
    %c0_145 = arith.constant 0 : index
    %367 = vector.load %arg9[%c0_144, %c0_145] : memref<16x128xf32, #tpu.memory_space<vmem>>, vector<16x128xf32>
    tpu.vector_store %arg9[%c0_144, %c0_145], %366 {strides = array<i32>} : memref<16x128xf32, #tpu.memory_space<vmem>>, vector<16x128xf32>,
    return
  }
}

</mosaic_0001>

<bundles_post_ra>
// kernel: tpu_custom_call.1
= control target key start
LH: loop header
LB: loop body
LE: loop exit
PB: predicated region body
PF: predicated region fallthrough
CT: control target
= control target key end

     0   :  { %17 = vsyncpa [#allocation5], 0  ;;  %s3218_s0 = inlined_call_operand.vmem [shape: f32[16,8], index: 0, kind: input, shape index: {}]   ;;  %s3219_s1 = inlined_call_operand.vmem [shape: f32[2,2,32], index: 1, kind: input, shape index: {}]   ;;  %s3220_s2 = inlined_call_operand.hbm [shape: f32[2,2,32], index: 2, kind: input, shape index: {}]   ;;  %s3221_s3 = inlined_call_operand.hbm [shape: f32[8,128], index: 3, kind: input, shape index: {}]   ;;  %s3222_s4 = inlined_call_operand.hbm [shape: f32[1,32,128], index: 4, kind: input, shape index: {}]   ;;  %s3223_s5 = inlined_call_operand.hbm [shape: f32[2,32,128], index: 5, kind: input, shape index: {}]   ;;  %s3224_s6 = inlined_call_operand.hbm [shape: f32[2,1,128], index: 6, kind: input, shape index: {}]   ;;  %s3225_s7 = inlined_call_operand.vmem [shape: f32[32,128], index: 7, kind: input, shape index: {}]   ;;  %s3226_s8 = inlined_call_operand.vmem [shape: f32[1,128], index: 8, kind: input, shape index: {}]   ;;  %s3227_s9 = inlined_call_operand.hbm [shape: f32[16,128], index: 9, kind: output, shape index: {0}]   ;;  %s3228_s10 = inlined_call_operand.hbm [shape: f32[2,2,32], index: 10, kind: output, shape index: {1}]   ;;  %s3229_s11 = inlined_call_operand.hbm [shape: f32[2,2,32], index: 11, kind: output, shape index: {2}]  }
   0x1   :  { %18 = vsyncpa [#allocation8], 0 }
   0x2   :  { %19 = vsyncpa [#allocation11], 0 }
   0x3   :  { %20 = vsyncpa [#allocation6], 0 }
   0x4   :  { %21 = vsyncpa [#allocation15], 0  ;;  %s2785_s17 = smov [#allocation7]  }
   0x5   :  { %s44_s18 = sshll.u32 %s2785_s17, 4  ;;  %s45_s18 = int_to_ptr.vmem [resolvable:$true] %s44_s18 }
   0x6   :  { %s2623_s19 = scalar_lea.vmem %s45_s18, 128  ;;  %p2628_p1 = scmp.lt.s32.totalorder %s45_s18, %s45_s18 }
   0x7   :  { %p2624_p0 = scmp.ne.s32.totalorder %s45_s18, %s2623_s19  ;;  %p2629_p2 = scmp.lt.s32.totalorder %s2623_s19, %s2623_s19 }
   0x9   :  { %p2630_p3 = por %p2629_p2, %p2628_p1 }
   0xb   :  { %p2631_p4 = pnand %p2630_p3, %p2624_p0 }
   0xd   :  { %2634 = shalt.err (!%p2631_p4)
}
   0xe   :  { %47 = dma.hbm_to_vmem [thread:$0]  %s3221_s3, 128, %s45_s18, [#allocation8]  }
   0xf   :  { %s2786_s22 = smov [#allocation10]   ;;  %s2787_s24 = smov [#allocation4]  }
  0x10   :  { %s65_s23 = sshll.u32 %s2786_s22, 4  ;;  %s31_s25 = sshll.u32 %s2787_s24, 4  ;;  %s66_s23 = int_to_ptr.vmem [resolvable:$true] %s65_s23  ;;  %s32_s25 = int_to_ptr.vmem [resolvable:$true] %s31_s25 }
  0x11   :  { %s2643_s26 = scalar_lea.vmem %s66_s23, 1024  ;;  %p2648_p6 = scmp.lt.s32.totalorder %s66_s23, %s66_s23 }
  0x12   :  { %p2644_p5 = scmp.ne.s32.totalorder %s66_s23, %s2643_s26  ;;  %p2649_p7 = scmp.lt.s32.totalorder %s2643_s26, %s2643_s26 }
  0x14   :  { %p2650_p8 = por %p2649_p7, %p2648_p6 }
  0x16   :  { %p2651_p9 = pnand %p2650_p8, %p2644_p5 }
  0x18   :  { %2654 = shalt.err (!%p2651_p9)
}
  0x19   :  { %s2788_s27 = smov 128   ;;  %s2789_s28 = smov 8  }
  0x1a   :  { %71 = dma.hbm_to_vmem [thread:$0]  %s3223_s5, 1024, %s66_s23, [#allocation11], %s2788_s27, %s2788_s27, %s2789_s28  }
  0x1b   :  { %s2663_s3 = scalar_lea.vmem %s32_s25, 64  ;;  %p2668_p11 = scmp.lt.s32.totalorder %s32_s25, %s32_s25 }
  0x1c   :  { %p2664_p10 = scmp.ne.s32.totalorder %s32_s25, %s2663_s3  ;;  %p2669_p12 = scmp.lt.s32.totalorder %s2663_s3, %s2663_s3 }
  0x1e   :  { %p2670_p13 = por %p2669_p12, %p2668_p11 }
  0x20   :  { %p2671_p0 = pnand %p2670_p13, %p2664_p10 }
  0x22   :  { %2674 = shalt.err (!%p2671_p0)
}
  0x23   :  { %s2790_s12 = smov 32   ;;  %s2791_s13 = smov 2  }
  0x24   :  { %37 = dma.hbm_to_vmem [thread:$0]  %s3220_s2, 64, %s32_s25, [#allocation5], %s2790_s12, %s2790_s12, %s2791_s13  }
  0x25   :  { %s2792_s16 = smov [#allocation9]   ;;  %s2793_s5 = smov [#allocation12]  }
  0x26   :  { %s53_s17 = sshll.u32 %s2792_s16, 4  ;;  %s77_s18 = sshll.u32 %s2793_s5, 4  ;;  %s54_s17 = int_to_ptr.vmem [resolvable:$true] %s53_s17  ;;  %s78_s18 = int_to_ptr.vmem [resolvable:$true] %s77_s18 }
  0x27   :  { %s2683_s19 = scalar_lea.vmem %s54_s17, 512  ;;  %p2688_p2 = scmp.lt.s32.totalorder %s54_s17, %s54_s17 }
  0x28   :  { %p2684_p1 = scmp.ne.s32.totalorder %s54_s17, %s2683_s19  ;;  %p2689_p3 = scmp.lt.s32.totalorder %s2683_s19, %s2683_s19 }
  0x2a   :  { %p2690_p4 = por %p2689_p3, %p2688_p2 }
  0x2c   :  { %p2691_p5 = pnand %p2690_p4, %p2684_p1 }
  0x2e   :  { %2694 = shalt.err (!%p2691_p5)
}
  0x2f   :  { %59 = dma.hbm_to_vmem [thread:$0]  %s3222_s4, 512, %s54_s17, [#allocation8], %s2788_s27, %s2788_s27, %s2789_s28  }
  0x30   :  { %s2703_s2 = scalar_lea.vmem %s78_s18, 32  ;;  %p2708_p7 = scmp.lt.s32.totalorder %s78_s18, %s78_s18 }
  0x31   :  { %p2704_p6 = scmp.ne.s32.totalorder %s78_s18, %s2703_s2  ;;  %p2709_p8 = scmp.lt.s32.totalorder %s2703_s2, %s2703_s2 }
  0x33   :  { %p2710_p9 = por %p2709_p8, %p2708_p7 }
  0x35   :  { %p2711_p10 = pnand %p2710_p9, %p2704_p6 }
  0x37   :  { %2714 = shalt.err (!%p2711_p10)
}
  0x38   :  { %s2794_s22 = smov 16   ;;  %s2795_s23 = smov 1  }
  0x39   :  { %83 = dma.hbm_to_vmem [thread:$0]  %s3224_s6, 32, %s78_s18, [#allocation11], %s2794_s22, %s2794_s22, %s2795_s23  }
  0x3a   :  { %2775 = dma.done.wait [#allocation5], 64  }
  0x3b   :  { %2776 = vsyncadd [#allocation5], 4294967232 }
  0x3c   :  { %2777 = dma.done.wait [#allocation8], 640  }
  0x3d   :  { %2778 = vsyncadd [#allocation8], 4294966656 }
  0x3e   :  { %2779 = dma.done.wait [#allocation11], 1056  }
  0x3f   :  { %2780 = vsyncadd [#allocation11], 4294966240  ;;  %v2796_v0 = vmov 0.0   ;;  %vm2797_vm0 = vmmov 0   ;;  %vm117_vm1 = vcmask 64512   ;;  %v110_v1 = vld [vmem:[#allocation7] sm:$0xff] }
  0x40   :  { %2271 = vmatprep.subr.mxu1 %v2796_v0  ;;  %2279 = vmatprep.mubr.msk.f32.mxu1 %vm2797_vm0, %v2796_v0  ;;  %v108_v2 = vld [vmem:[%s3218_s0] sm:$0xff]  ;;  %v109_v3 = vld [vmem:[%s3218_s0 + $0x8] sm:$0xff]  ;;  %v2902_v6 = vld [vmem:[#allocation10 + $0x8] sm:$0xff]  ;;  %vm204_vm2 = vcmask 261120   ;;  %s2798_s3 = smov 64   ;;  %vm311_vm3 = vcmask 254976  }
  0x41   :  { %2266 = vmatprep.subr.mxu0 %v110_v1  ;;  %2268 = vmatprep.mubr.msk.f32.mxu0 %vm117_vm1, %v108_v2  ;;  %v2896_v4 = vld [vmem:[#allocation10 + $0x18] sm:$0xff]  ;;  %v2898_v5 = vld [vmem:[#allocation10 + $0x10] sm:$0xff]  ;;  %v2907_v7 = vld [vmem:[#allocation10] sm:$0xff] }
  0x42   :  { %2267 = vmatpush3.msra.mxu0 %v110_v1  ;;  %2272 = vmatpush3.msra.mxu1 %v2896_v4  ;;  %v201_v8 = vld [vmem:[%s3219_s1] sm:$0x3]  ;;  %v2129_v9 = vld [vmem:[#allocation12] ss:$0 sm:$0xff] }
  0x43   :  { %2269 = vmatmul.mubr.msk.f32.vlgmr.msra.gmra.mxu0 %vm117_vm1, %v109_v3  ;;  %2273 = vmatprep.subr.mxu1 %v2796_v0  ;;  %v202_v19 = vld [vmem:[#allocation4] sm:$0x3] }
  0x44   :  { %2274 = vmatpush3.msra.mxu1 %v2898_v5  ;;  %2282 = vmatprep.subr.mxu0 %v2796_v0 }
  0x45   :  { %2275 = vmatprep.subr.mxu1 %v2796_v0  ;;  %2283 = vmatpush3.msra.mxu0 %v2896_v4 }
  0x46   :  { %2276 = vmatpush3.msra.mxu1 %v2902_v6  ;;  %2284 = vmatprep.subr.mxu0 %v2796_v0 }
  0x47   :  { %2277 = vmatprep.subr.mxu1 %v2796_v0  ;;  %2285 = vmatpush3.msra.mxu0 %v2898_v5 }
  0x48   :  { %2278 = vmatpush3.msra.mxu1 %v2907_v7  ;;  %2286 = vmatprep.subr.mxu0 %v2796_v0 }
  0x49   :  { %2280 = vmatmul.mubr.msk.f32.vlgmr.msra.gmra.mxu1 %vm204_vm2, %v201_v8  ;;  %2287 = vmatpush3.msra.mxu0 %v2902_v6 }
  0x4a   :  { %2288 = vmatprep.subr.mxu0 %v2796_v0  ;;  %2290 = vmatprep.mubr.msk.f32.mxu0 %vm2797_vm0, %v2796_v0 }
  0x4b   :  { %2289 = vmatpush3.msra.mxu0 %v2907_v7  ;;  %2293 = vmatprep.subr.mxu1 %v2796_v0 }
  0x4c   :  { %2294 = vmatpush3.msra.mxu1 %v2896_v4  ;;  %2301 = vmatprep.mubr.msk.f32.mxu1 %vm2797_vm0, %v2796_v0 }
  0x4d   :  { %2295 = vmatprep.subr.mxu1 %v2796_v0  ;;  %2304 = vmatprep.subr.mxu0 %v2796_v0 }
  0x4e   :  { %2296 = vmatpush3.msra.mxu1 %v2898_v5 }
  0x4f   :  { %2297 = vmatprep.subr.mxu1 %v2796_v0 }
  0x50   :  { %2298 = vmatpush3.msra.mxu1 %v2902_v6 }
  0x51   :  { %2299 = vmatprep.subr.mxu1 %v2796_v0 }
  0x52   :  { %2300 = vmatpush3.msra.mxu1 %v2907_v7 }
  0x53   :  { %2315 = vmatprep.subr.mxu1 %v2796_v0 }
 0x103   :  { %v2270_v10 = vpop.f32.mrf.mxu0 }
 0x104   :  { %v196_v11 = vadd.f32 %v2270_v10, %v2129_v9 }
 0x105   :  { %v190_v12 = vpop.f32.mrf.mxu0 }
 0x106   :  { %200 = vst [vmem:[#allocation3 + $0x8] sm:$0xff] %v196_v11  ;;  %v191_v13 = vadd.f32 %v2129_v9, %v190_v12 }
 0x108   :  { %199 = vst [vmem:[#allocation3] sm:$0xff] %v191_v13 }
 0x109   :  { %v274_v14 = vpop.f32.mrf.mxu1 }
 0x10b   :  { %v2281_v15 = vpop.f32.mrf.mxu1 }
 0x10f   :  { %v203_v16 = vld [vmem:[#allocation3] sm:$0x3]  ;;  %v313_v34 = vld [vmem:[#allocation3 + $0x2] sm:$0x3]  ;;  %v416_v52 = vld [vmem:[#allocation3 + $0x4] sm:$0x3] }
 0x110   :  { %v278_v17 = vadd.f32 %v274_v14, %v203_v16  ;;  %v519_v11 = vld [vmem:[#allocation3 + $0x6] sm:$0x3] }
 0x112   :  { %2487 = vtanh.f32 %v278_v17  ;;  %v2133_v20 = vmul.f32 -1.442695, %v278_v17 }
 0x114   :  { %2489 = vpow2.f32 %v2133_v20 }
 0x11f   :  { %v2488_v18 = vpop.eup %2487 }
 0x120   :  { %292 = vrot.lane.b32.xlu0 %v2488_v18, %s2790_s12 }
 0x121   :  { %v2490_v21 = vpop.eup %2489 }
 0x122   :  { %v282_v22 = vadd.f32 1.0, %v2490_v21 }
 0x124   :  { %287 = vrot.lane.b32.xlu0 %v202_v19, %s2790_s12  ;;  %2491 = vrcp.f32 %v282_v22 }
 0x131   :  { %v2492_v23 = vpop.eup %2491 }
 0x192   :  { %v293_v24 = vpop.permute.xlu0 %292 }
 0x193   :  { %v295_v25 = vmul.f32 %v2492_v23, %v293_v24 }
 0x195   :  { %297 = vrot.lane.b32.xlu1 %v295_v25, %s2790_s12 }
 0x196   :  { %v288_v26 = vpop.permute.xlu0 %287 }
 0x197   :  { %v290_v27 = vmul.f32 %v2492_v23, %v288_v26 }
 0x207   :  { %v298_v28 = vpop.permute.xlu1 %297 }
 0x208   :  { %v300_v29 = vadd.f32 %v298_v28, %v290_v27 }
 0x20a   :  { %2493 = vtanh.f32 %v300_v29 }
 0x217   :  { %v2494_v30 = vpop.eup %2493 }
 0x218   :  { %303 = vrot.lane.b32.xlu1 %v2494_v30, %s2790_s12 }
 0x28a   :  { %v304_v31 = vpop.permute.xlu1 %303 }
 0x28b   :  { %v306_v32 = vmul.f32 %v2492_v23, %v304_v31 }
 0x28d   :  { %308 = vrot.lane.b32.xlu0 %v306_v32, %s2798_s3 }
 0x2ff   :  { %v309_v33 = vpop.permute.xlu0 %308 }
 0x300   :  { %312 = vst.msk [vmem:[#allocation2] sm:$0x3] %vm311_vm3, %v309_v33  ;;  %2291 = vmatmul.mubr.msk.f32.vlgmr.msra.gmra.mxu0 %vm204_vm2, %v309_v33 }
 0x301   :  { %2305 = vmatpush3.msra.mxu0 %v2896_v4  ;;  %2312 = vmatprep.mubr.msk.f32.mxu0 %vm2797_vm0, %v2796_v0 }
 0x302   :  { %2306 = vmatprep.subr.mxu0 %v2796_v0 }
 0x303   :  { %2307 = vmatpush3.msra.mxu0 %v2898_v5 }
 0x304   :  { %2308 = vmatprep.subr.mxu0 %v2796_v0 }
 0x305   :  { %2309 = vmatpush3.msra.mxu0 %v2902_v6 }
 0x306   :  { %2310 = vmatprep.subr.mxu0 %v2796_v0 }
 0x307   :  { %2311 = vmatpush3.msra.mxu0 %v2907_v7 }
 0x308   :  { %2326 = vmatprep.subr.mxu0 %v2796_v0 }
 0x3c0   :  { %v382_v35 = vpop.f32.mrf.mxu0 }
 0x3c1   :  { %v386_v36 = vadd.f32 %v382_v35, %v313_v34 }
 0x3c2   :  { %v2292_v37 = vpop.f32.mrf.mxu0 }
 0x3c3   :  { %2495 = vtanh.f32 %v386_v36  ;;  %v2135_v39 = vmul.f32 -1.442695, %v386_v36 }
 0x3c5   :  { %2497 = vpow2.f32 %v2135_v39 }
 0x3d0   :  { %v2496_v38 = vpop.eup %2495 }
 0x3d1   :  { %396 = vrot.lane.b32.xlu1 %v2496_v38, %s2790_s12 }
 0x3d2   :  { %v2498_v40 = vpop.eup %2497 }
 0x3d3   :  { %v390_v41 = vadd.f32 1.0, %v2498_v40 }
 0x3d5   :  { %2499 = vrcp.f32 %v390_v41 }
 0x3e2   :  { %v2500_v42 = vpop.eup %2499 }
 0x3e3   :  { %v394_v45 = vmul.f32 %v2500_v42, %v300_v29  ;;  %v622_v29 = vld [vmem:[#allocation3 + $0x8] sm:$0x3] }
 0x443   :  { %v397_v43 = vpop.permute.xlu1 %396 }
 0x444   :  { %v399_v44 = vmul.f32 %v2500_v42, %v397_v43 }
 0x446   :  { %401 = vrot.lane.b32.xlu0 %v399_v44, %s2790_s12 }
 0x4b8   :  { %v402_v46 = vpop.permute.xlu0 %401 }
 0x4b9   :  { %v404_v47 = vadd.f32 %v402_v46, %v394_v45 }
 0x4bb   :  { %2501 = vtanh.f32 %v404_v47 }
 0x4c8   :  { %v2502_v48 = vpop.eup %2501 }
 0x4c9   :  { %407 = vrot.lane.b32.xlu1 %v2502_v48, %s2790_s12 }
 0x53b   :  { %v408_v49 = vpop.permute.xlu1 %407 }
 0x53c   :  { %v410_v50 = vmul.f32 %v2500_v42, %v408_v49 }
 0x53e   :  { %412 = vrot.lane.b32.xlu0 %v410_v50, %s2798_s3 }
 0x5b0   :  { %v413_v51 = vpop.permute.xlu0 %412 }
 0x5b1   :  { %415 = vst.msk [vmem:[#allocation2 + $0x2] sm:$0x3] %vm311_vm3, %v413_v51  ;;  %2302 = vmatmul.mubr.msk.f32.vlgmr.msra.gmra.mxu1 %vm204_vm2, %v413_v51 }
 0x5b2   :  { %2316 = vmatpush3.msra.mxu1 %v2896_v4  ;;  %2323 = vmatprep.mubr.msk.f32.mxu1 %vm2797_vm0, %v2796_v0 }
 0x5b3   :  { %2317 = vmatprep.subr.mxu1 %v2796_v0 }
 0x5b4   :  { %2318 = vmatpush3.msra.mxu1 %v2898_v5 }
 0x5b5   :  { %2319 = vmatprep.subr.mxu1 %v2796_v0 }
 0x5b6   :  { %2320 = vmatpush3.msra.mxu1 %v2902_v6 }
 0x5b7   :  { %2321 = vmatprep.subr.mxu1 %v2796_v0 }
 0x5b8   :  { %2322 = vmatpush3.msra.mxu1 %v2907_v7 }
 0x5b9   :  { %2337 = vmatprep.subr.mxu1 %v2796_v0 }
 0x671   :  { %v485_v53 = vpop.f32.mrf.mxu1 }
 0x672   :  { %v489_v54 = vadd.f32 %v485_v53, %v416_v52 }
 0x673   :  { %v2303_v55 = vpop.f32.mrf.mxu1 }
 0x674   :  { %2503 = vtanh.f32 %v489_v54  ;;  %v2137_v57 = vmul.f32 -1.442695, %v489_v54 }
 0x676   :  { %2505 = vpow2.f32 %v2137_v57 }
 0x681   :  { %v2504_v56 = vpop.eup %2503 }
 0x682   :  { %499 = vrot.lane.b32.xlu1 %v2504_v56, %s2790_s12 }
 0x683   :  { %v2506_v58 = vpop.eup %2505 }
 0x684   :  { %v493_v59 = vadd.f32 1.0, %v2506_v58 }
 0x686   :  { %2507 = vrcp.f32 %v493_v59 }
 0x693   :  { %v2508_v60 = vpop.eup %2507 }
 0x694   :  { %v497_v63 = vmul.f32 %v2508_v60, %v404_v47  ;;  %v725_v47 = vld [vmem:[#allocation3 + $0xa] sm:$0x3] }
 0x6f4   :  { %v500_v61 = vpop.permute.xlu1 %499 }
 0x6f5   :  { %v502_v62 = vmul.f32 %v2508_v60, %v500_v61 }
 0x6f7   :  { %504 = vrot.lane.b32.xlu0 %v502_v62, %s2790_s12  ;;  %v828_v62 = vld [vmem:[#allocation3 + $0xc] sm:$0x3] }
 0x769   :  { %v505_v1 = vpop.permute.xlu0 %504 }
 0x76a   :  { %v507_v2 = vadd.f32 %v505_v1, %v497_v63 }
 0x76c   :  { %2509 = vtanh.f32 %v507_v2 }
 0x779   :  { %v2510_v3 = vpop.eup %2509 }
 0x77a   :  { %510 = vrot.lane.b32.xlu1 %v2510_v3, %s2790_s12 }
 0x7ec   :  { %v511_v8 = vpop.permute.xlu1 %510 }
 0x7ed   :  { %v513_v9 = vmul.f32 %v2508_v60, %v511_v8 }
 0x7ef   :  { %515 = vrot.lane.b32.xlu0 %v513_v9, %s2798_s3 }
 0x861   :  { %v516_v10 = vpop.permute.xlu0 %515 }
 0x862   :  { %518 = vst.msk [vmem:[#allocation2 + $0x4] sm:$0x3] %vm311_vm3, %v516_v10  ;;  %2313 = vmatmul.mubr.msk.f32.vlgmr.msra.gmra.mxu0 %vm204_vm2, %v516_v10 }
 0x863   :  { %2327 = vmatpush3.msra.mxu0 %v2896_v4  ;;  %2334 = vmatprep.mubr.msk.f32.mxu0 %vm2797_vm0, %v2796_v0 }
 0x864   :  { %2328 = vmatprep.subr.mxu0 %v2796_v0 }
 0x865   :  { %2329 = vmatpush3.msra.mxu0 %v2898_v5 }
 0x866   :  { %2330 = vmatprep.subr.mxu0 %v2796_v0 }
 0x867   :  { %2331 = vmatpush3.msra.mxu0 %v2902_v6 }
 0x868   :  { %2332 = vmatprep.subr.mxu0 %v2796_v0 }
 0x869   :  { %2333 = vmatpush3.msra.mxu0 %v2907_v7 }
 0x86a   :  { %2348 = vmatprep.subr.mxu0 %v2796_v0 }
 0x922   :  { %v588_v12 = vpop.f32.mrf.mxu0 }
 0x923   :  { %v592_v13 = vadd.f32 %v588_v12, %v519_v11 }
 0x924   :  { %v2314_v14 = vpop.f32.mrf.mxu0 }
 0x925   :  { %2511 = vtanh.f32 %v592_v13  ;;  %v2139_v16 = vmul.f32 -1.442695, %v592_v13 }
 0x927   :  { %2513 = vpow2.f32 %v2139_v16 }
 0x932   :  { %v2512_v15 = vpop.eup %2511 }
 0x933   :  { %602 = vrot.lane.b32.xlu1 %v2512_v15, %s2790_s12 }
 0x934   :  { %v2514_v17 = vpop.eup %2513 }
 0x935   :  { %v596_v18 = vadd.f32 1.0, %v2514_v17 }
 0x937   :  { %2515 = vrcp.f32 %v596_v18 }
 0x944   :  { %v2516_v19 = vpop.eup %2515 }
 0x945   :  { %v600_v22 = vmul.f32 %v2516_v19, %v507_v2 }
 0x9a5   :  { %v603_v20 = vpop.permute.xlu1 %602 }
 0x9a6   :  { %v605_v21 = vmul.f32 %v2516_v19, %v603_v20 }
 0x9a8   :  { %607 = vrot.lane.b32.xlu0 %v605_v21, %s2790_s12  ;;  %v931_v21 = vld [vmem:[#allocation3 + $0xe] sm:$0x3] }
 0xa1a   :  { %v608_v23 = vpop.permute.xlu0 %607 }
 0xa1b   :  { %v610_v24 = vadd.f32 %v608_v23, %v600_v22 }
 0xa1d   :  { %2517 = vtanh.f32 %v610_v24 }
 0xa2a   :  { %v2518_v25 = vpop.eup %2517 }
 0xa2b   :  { %613 = vrot.lane.b32.xlu1 %v2518_v25, %s2790_s12 }
 0xa9d   :  { %v614_v26 = vpop.permute.xlu1 %613 }
 0xa9e   :  { %v616_v27 = vmul.f32 %v2516_v19, %v614_v26 }
 0xaa0   :  { %618 = vrot.lane.b32.xlu0 %v616_v27, %s2798_s3 }
 0xb12   :  { %v619_v28 = vpop.permute.xlu0 %618 }
 0xb13   :  { %621 = vst.msk [vmem:[#allocation2 + $0x6] sm:$0x3] %vm311_vm3, %v619_v28  ;;  %2324 = vmatmul.mubr.msk.f32.vlgmr.msra.gmra.mxu1 %vm204_vm2, %v619_v28 }
 0xb14   :  { %2338 = vmatpush3.msra.mxu1 %v2896_v4  ;;  %2345 = vmatprep.mubr.msk.f32.mxu1 %vm2797_vm0, %v2796_v0 }
 0xb15   :  { %2339 = vmatprep.subr.mxu1 %v2796_v0 }
 0xb16   :  { %2340 = vmatpush3.msra.mxu1 %v2898_v5 }
 0xb17   :  { %2341 = vmatprep.subr.mxu1 %v2796_v0 }
 0xb18   :  { %2342 = vmatpush3.msra.mxu1 %v2902_v6 }
 0xb19   :  { %2343 = vmatprep.subr.mxu1 %v2796_v0 }
 0xb1a   :  { %2344 = vmatpush3.msra.mxu1 %v2907_v7  ;;  %v1047_v61 = vld [vmem:[#allocation2] sm:$0xff] }
 0xbd3   :  { %v691_v30 = vpop.f32.mrf.mxu1 }
 0xbd4   :  { %v695_v31 = vadd.f32 %v691_v30, %v622_v29 }
 0xbd5   :  { %v2325_v32 = vpop.f32.mrf.mxu1 }
 0xbd6   :  { %2519 = vtanh.f32 %v695_v31  ;;  %v2141_v34 = vmul.f32 -1.442695, %v695_v31 }
 0xbd8   :  { %2521 = vpow2.f32 %v2141_v34 }
 0xbe3   :  { %v2520_v33 = vpop.eup %2519 }
 0xbe4   :  { %705 = vrot.lane.b32.xlu1 %v2520_v33, %s2790_s12 }
 0xbe5   :  { %v2522_v35 = vpop.eup %2521 }
 0xbe6   :  { %v699_v36 = vadd.f32 1.0, %v2522_v35 }
 0xbe8   :  { %2523 = vrcp.f32 %v699_v36  ;;  %v1052_v36 = vld [vmem:[#allocation9 + $0x18] sm:$0xff] }
 0xbe9   :  { %2359 = vmatprep.subr.mxu1 %v1052_v36 }
 0xbf5   :  { %v2524_v37 = vpop.eup %2523 }
 0xbf6   :  { %v703_v40 = vmul.f32 %v2524_v37, %v610_v24 }
 0xc56   :  { %v706_v38 = vpop.permute.xlu1 %705 }
 0xc57   :  { %v708_v39 = vmul.f32 %v2524_v37, %v706_v38  ;;  %v1050_v38 = vld [vmem:[#allocation9 + $0x8] sm:$0xff] }
 0xc59   :  { %710 = vrot.lane.b32.xlu0 %v708_v39, %s2790_s12  ;;  %v1049_v39 = vld [vmem:[#allocation9] sm:$0xff] }
 0xccb   :  { %v711_v41 = vpop.permute.xlu0 %710 }
 0xccc   :  { %v713_v42 = vadd.f32 %v711_v41, %v703_v40  ;;  %v3038_v40 = vld [vmem:[#allocation10 + $0x38] sm:$0xff]  ;;  %v3040_v41 = vld [vmem:[#allocation10 + $0x30] sm:$0xff] }
 0xcce   :  { %2525 = vtanh.f32 %v713_v42 }
 0xcdb   :  { %v2526_v43 = vpop.eup %2525 }
 0xcdc   :  { %716 = vrot.lane.b32.xlu1 %v2526_v43, %s2790_s12  ;;  %v3045_v43 = vld [vmem:[#allocation10 + $0x28] sm:$0xff] }
 0xd4e   :  { %v717_v44 = vpop.permute.xlu1 %716 }
 0xd4f   :  { %v719_v45 = vmul.f32 %v2524_v37, %v717_v44  ;;  %v1051_v37 = vld [vmem:[#allocation9 + $0x10] sm:$0xff] }
 0xd51   :  { %721 = vrot.lane.b32.xlu0 %v719_v45, %s2798_s3  ;;  %v3049_v45 = vld [vmem:[#allocation10 + $0x20] sm:$0xff] }
 0xdc3   :  { %v722_v46 = vpop.permute.xlu0 %721 }
 0xdc4   :  { %724 = vst.msk [vmem:[#allocation2 + $0x8] sm:$0x3] %vm311_vm3, %v722_v46  ;;  %2335 = vmatmul.mubr.msk.f32.vlgmr.msra.gmra.mxu0 %vm204_vm2, %v722_v46  ;;  %v2151_v46 = vld [vmem:[%s3219_s1 + $0x2] sm:$0x3]  ;;  %s2799_s1 = smov 96  }
 0xdc5   :  { %2349 = vmatpush3.msra.mxu0 %v2896_v4  ;;  %2356 = vmatprep.mubr.msk.f32.mxu0 %vm2797_vm0, %v2796_v0 }
 0xdc6   :  { %2350 = vmatprep.subr.mxu0 %v2796_v0 }
 0xdc7   :  { %2351 = vmatpush3.msra.mxu0 %v2898_v5 }
 0xdc8   :  { %2352 = vmatprep.subr.mxu0 %v2796_v0 }
 0xdc9   :  { %2353 = vmatpush3.msra.mxu0 %v2902_v6 }
 0xdca   :  { %2354 = vmatprep.subr.mxu0 %v2796_v0 }
 0xdcb   :  { %2355 = vmatpush3.msra.mxu0 %v2907_v7 }
 0xdcc   :  { %2370 = vmatprep.subr.mxu0 %v2796_v0 }
 0xe84   :  { %v794_v48 = vpop.f32.mrf.mxu0 }
 0xe85   :  { %v798_v4 = vadd.f32 %v794_v48, %v725_v47  ;;  %v1145_v47 = vld [vmem:[#allocation4 + $0x2] sm:$0x3] }
 0xe86   :  { %v2336_v49 = vpop.f32.mrf.mxu0 }
 0xe87   :  { %2527 = vtanh.f32 %v798_v4  ;;  %v2143_v51 = vmul.f32 -1.442695, %v798_v4 }
 0xe89   :  { %2529 = vpow2.f32 %v2143_v51  ;;  %v2148_v51 = vld [vmem:[#allocation12 + $0x1] ss:$0 sm:$0xff] }
 0xe94   :  { %v2528_v50 = vpop.eup %2527 }
 0xe95   :  { %808 = vrot.lane.b32.xlu1 %v2528_v50, %s2790_s12 }
 0xe96   :  { %v2530_v5 = vpop.eup %2529 }
 0xe97   :  { %v802_v52 = vadd.f32 1.0, %v2530_v5 }
 0xe99   :  { %2531 = vrcp.f32 %v802_v52 }
 0xea6   :  { %v2532_v6 = vpop.eup %2531 }
 0xea7   :  { %v806_v7 = vmul.f32 %v2532_v6, %v713_v42 }
 0xf07   :  { %v809_v53 = vpop.permute.xlu1 %808 }
 0xf08   :  { %v811_v54 = vmul.f32 %v2532_v6, %v809_v53 }
 0xf0a   :  { %813 = vrot.lane.b32.xlu0 %v811_v54, %s2790_s12 }
 0xf7c   :  { %v814_v55 = vpop.permute.xlu0 %813 }
 0xf7d   :  { %v816_v56 = vadd.f32 %v814_v55, %v806_v7 }
 0xf7f   :  { %2533 = vtanh.f32 %v816_v56 }
 0xf8c   :  { %v2534_v57 = vpop.eup %2533 }
 0xf8d   :  { %819 = vrot.lane.b32.xlu1 %v2534_v57, %s2790_s12 }
 0xfff   :  { %v820_v58 = vpop.permute.xlu1 %819 }
0x1000   :  { %v822_v59 = vmul.f32 %v2532_v6, %v820_v58 }
0x1002   :  { %824 = vrot.lane.b32.xlu0 %v822_v59, %s2798_s3 }
0x1074   :  { %v825_v60 = vpop.permute.xlu0 %824 }
0x1075   :  { %827 = vst.msk [vmem:[#allocation2 + $0xa] sm:$0x3] %vm311_vm3, %v825_v60  ;;  %2346 = vmatmul.mubr.msk.f32.vlgmr.msra.gmra.mxu1 %vm204_vm2, %v825_v60 }
0x1076   :  { %2367 = vmatprep.mubr.msk.f32.mxu1 %vm204_vm2, %v1047_v61  ;;  %2360 = vmatpush3.msra.mxu1 %v1052_v36 }
0x1077   :  { %2361 = vmatprep.subr.mxu1 %v1051_v37 }
0x1078   :  { %2362 = vmatpush3.msra.mxu1 %v1051_v37 }
0x1079   :  { %2363 = vmatprep.subr.mxu1 %v1050_v38 }
0x107a   :  { %2364 = vmatpush3.msra.mxu1 %v1050_v38 }
0x107b   :  { %2365 = vmatprep.subr.mxu1 %v1049_v39 }
0x107c   :  { %2366 = vmatpush3.msra.mxu1 %v1049_v39 }
0x107d   :  { %2381 = vmatprep.subr.mxu1 %v2796_v0 }
0x1135   :  { %v897_v63 = vpop.f32.mrf.mxu1 }
0x1136   :  { %v901_v1 = vadd.f32 %v897_v63, %v828_v62 }
0x1137   :  { %v2347_v2 = vpop.f32.mrf.mxu1 }
0x1138   :  { %2535 = vtanh.f32 %v901_v1  ;;  %v2145_v8 = vmul.f32 -1.442695, %v901_v1 }
0x113a   :  { %2537 = vpow2.f32 %v2145_v8 }
0x1145   :  { %v2536_v3 = vpop.eup %2535 }
0x1146   :  { %911 = vrot.lane.b32.xlu1 %v2536_v3, %s2790_s12 }
0x1147   :  { %v2538_v9 = vpop.eup %2537 }
0x1148   :  { %v905_v10 = vadd.f32 1.0, %v2538_v9 }
0x114a   :  { %2539 = vrcp.f32 %v905_v10 }
0x1157   :  { %v2540_v11 = vpop.eup %2539 }
0x1158   :  { %v909_v14 = vmul.f32 %v2540_v11, %v816_v56 }
0x11b8   :  { %v912_v12 = vpop.permute.xlu1 %911 }
0x11b9   :  { %v914_v13 = vmul.f32 %v2540_v11, %v912_v12 }
0x11bb   :  { %916 = vrot.lane.b32.xlu0 %v914_v13, %s2790_s12 }
0x122d   :  { %v917_v15 = vpop.permute.xlu0 %916 }
0x122e   :  { %v919_v16 = vadd.f32 %v917_v15, %v909_v14 }
0x1230   :  { %2541 = vtanh.f32 %v919_v16 }
0x123d   :  { %v2542_v17 = vpop.eup %2541 }
0x123e   :  { %922 = vrot.lane.b32.xlu1 %v2542_v17, %s2790_s12 }
0x12b0   :  { %v923_v18 = vpop.permute.xlu1 %922 }
0x12b1   :  { %v925_v19 = vmul.f32 %v2540_v11, %v923_v18 }
0x12b3   :  { %927 = vrot.lane.b32.xlu0 %v925_v19, %s2798_s3 }
0x1325   :  { %v928_v20 = vpop.permute.xlu0 %927 }
0x1326   :  { %930 = vst.msk [vmem:[#allocation2 + $0xc] sm:$0x3] %vm311_vm3, %v928_v20  ;;  %2357 = vmatmul.mubr.msk.f32.vlgmr.msra.gmra.mxu0 %vm204_vm2, %v928_v20 }
0x1327   :  { %2378 = vmatprep.mubr.msk.f32.mxu0 %vm2797_vm0, %v2796_v0  ;;  %2371 = vmatpush3.msra.mxu0 %v3038_v40 }
0x1328   :  { %2372 = vmatprep.subr.mxu0 %v2796_v0 }
0x1329   :  { %2373 = vmatpush3.msra.mxu0 %v3040_v41 }
0x132a   :  { %2374 = vmatprep.subr.mxu0 %v2796_v0 }
0x132b   :  { %2375 = vmatpush3.msra.mxu0 %v3045_v43 }
0x132c   :  { %2376 = vmatprep.subr.mxu0 %v2796_v0 }
0x132d   :  { %2377 = vmatpush3.msra.mxu0 %v3049_v45 }
0x132e   :  { %2379 = vmatmul.mubr.msk.f32.vlgmr.msra.gmra.mxu0 %vm204_vm2, %v2151_v46  ;;  %2392 = vmatprep.subr.mxu0 %v2796_v0 }
0x132f   :  { %2393 = vmatpush3.msra.mxu0 %v3038_v40  ;;  %2400 = vmatprep.mubr.msk.f32.mxu0 %vm2797_vm0, %v2796_v0 }
0x1330   :  { %2394 = vmatprep.subr.mxu0 %v2796_v0 }
0x1331   :  { %2395 = vmatpush3.msra.mxu0 %v3040_v41 }
0x1332   :  { %2396 = vmatprep.subr.mxu0 %v2796_v0 }
0x1333   :  { %2397 = vmatpush3.msra.mxu0 %v3045_v43 }
0x1334   :  { %2398 = vmatprep.subr.mxu0 %v2796_v0 }
0x1335   :  { %2399 = vmatpush3.msra.mxu0 %v3049_v45 }
0x1336   :  { %2414 = vmatprep.subr.mxu0 %v2796_v0 }
0x13e6   :  { %v1000_v22 = vpop.f32.mrf.mxu0 }
0x13e7   :  { %v1004_v23 = vadd.f32 %v1000_v22, %v931_v21 }
0x13e8   :  { %v2358_v24 = vpop.f32.mrf.mxu0 }
0x13e9   :  { %2543 = vtanh.f32 %v1004_v23  ;;  %v2147_v26 = vmul.f32 -1.442695, %v1004_v23 }
0x13eb   :  { %2545 = vpow2.f32 %v2147_v26 }
0x13ee   :  { %v1216_v49 = vpop.f32.mrf.mxu0 }
0x13f0   :  { %v2380_v50 = vpop.f32.mrf.mxu0 }
0x13f6   :  { %v2544_v25 = vpop.eup %2543 }
0x13f7   :  { %1014 = vrot.lane.b32.xlu1 %v2544_v25, %s2790_s12 }
0x13f8   :  { %v2546_v27 = vpop.eup %2545 }
0x13f9   :  { %v1008_v28 = vadd.f32 1.0, %v2546_v27 }
0x13fb   :  { %2547 = vrcp.f32 %v1008_v28 }
0x1408   :  { %v2548_v29 = vpop.eup %2547 }
0x1409   :  { %v1012_v32 = vmul.f32 %v2548_v29, %v919_v16 }
0x1469   :  { %v1015_v30 = vpop.permute.xlu1 %1014 }
0x146a   :  { %v1017_v31 = vmul.f32 %v2548_v29, %v1015_v30 }
0x146c   :  { %1019 = vrot.lane.b32.xlu0 %v1017_v31, %s2790_s12 }
0x14de   :  { %v1020_v33 = vpop.permute.xlu0 %1019 }
0x14df   :  { %v3034_v34 = vadd.f32 %v1020_v33, %v1012_v32 }
0x14e1   :  { %2549 = vtanh.f32 %v3034_v34 }
0x14ee   :  { %v2550_v35 = vpop.eup %2549 }
0x14ef   :  { %1025 = vrot.lane.b32.xlu1 %v2550_v35, %s2790_s12 }
0x1561   :  { %v1026_v42 = vpop.permute.xlu1 %1025 }
0x1562   :  { %v1028_v44 = vmul.f32 %v2548_v29, %v1026_v42 }
0x1564   :  { %1030 = vrot.lane.b32.xlu0 %v1028_v44, %s2798_s3 }
0x1568   :  { %1229 = vrot.lane.b32.xlu0 %v1145_v47, %s2790_s12 }
0x15d6   :  { %v1031_v48 = vpop.permute.xlu0 %1030 }
0x15d7   :  { %1033 = vst.msk [vmem:[#allocation2 + $0xe] sm:$0x3] %vm311_vm3, %v1031_v48  ;;  %1034 = vst.msk [vmem:[#allocation14] sm:$0x3] %vm311_vm3, %v1031_v48 }
0x15da   :  { %v1230_v62 = vpop.permute.xlu0 %1229 }
0x15de   :  { %v1048_v4 = vld [vmem:[#allocation2 + $0x8] sm:$0xff] }
0x15df   :  { %2368 = vmatmul.mubr.msk.f32.vlgmr.msra.gmra.mxu1 %vm204_vm2, %v1048_v4 }
0x15e0   :  { %2382 = vmatpush3.msra.mxu1 %v3038_v40  ;;  %2389 = vmatprep.mubr.msk.f32.mxu1 %vm2797_vm0, %v2796_v0 }
0x15e1   :  { %2383 = vmatprep.subr.mxu1 %v2796_v0 }
0x15e2   :  { %2384 = vmatpush3.msra.mxu1 %v3040_v41 }
0x15e3   :  { %2385 = vmatprep.subr.mxu1 %v2796_v0 }
0x15e4   :  { %2386 = vmatpush3.msra.mxu1 %v3045_v43 }
0x15e5   :  { %2387 = vmatprep.subr.mxu1 %v2796_v0 }
0x15e6   :  { %2388 = vmatpush3.msra.mxu1 %v3049_v45 }
0x15e7   :  { %2403 = vmatprep.subr.mxu1 %v2796_v0 }
0x169f   :  { %v2369_v5 = vpop.f32.mrf.mxu1 }
0x16a0   :  { %v1137_v52 = vadd.f32 %v2369_v5, %v2148_v51 }
0x16a1   :  { %v1131_v6 = vpop.f32.mrf.mxu1 }
0x16a2   :  { %1141 = vst [vmem:[#allocation3 + $0x8] sm:$0xff] %v1137_v52  ;;  %v1132_v53 = vadd.f32 %v2148_v51, %v1131_v6 }
0x16a4   :  { %1140 = vst [vmem:[#allocation3] sm:$0xff] %v1132_v53 }
0x16ab   :  { %v1146_v54 = vld [vmem:[#allocation3] sm:$0x3]  ;;  %v1254_v11 = vld [vmem:[#allocation3 + $0x2] sm:$0x3]  ;;  %v1357_v29 = vld [vmem:[#allocation3 + $0x4] sm:$0x3] }
0x16ac   :  { %v1220_v7 = vadd.f32 %v1216_v49, %v1146_v54  ;;  %v1460_v51 = vld [vmem:[#allocation3 + $0x6] sm:$0x3] }
0x16ae   :  { %2551 = vtanh.f32 %v1220_v7  ;;  %v2153_v56 = vmul.f32 -1.442695, %v1220_v7 }
0x16b0   :  { %2553 = vpow2.f32 %v2153_v56 }
0x16bb   :  { %v2552_v55 = vpop.eup %2551 }
0x16bc   :  { %1234 = vrot.lane.b32.xlu1 %v2552_v55, %s2790_s12 }
0x16bd   :  { %v2554_v57 = vpop.eup %2553 }
0x16be   :  { %v1224_v58 = vadd.f32 1.0, %v2554_v57 }
0x16c0   :  { %2555 = vrcp.f32 %v1224_v58 }
0x16cd   :  { %v2556_v59 = vpop.eup %2555 }
0x16ce   :  { %v1232_v63 = vmul.f32 %v2556_v59, %v1230_v62 }
0x172e   :  { %v1235_v60 = vpop.permute.xlu1 %1234 }
0x172f   :  { %v1237_v61 = vmul.f32 %v2556_v59, %v1235_v60 }
0x1731   :  { %1239 = vrot.lane.b32.xlu1 %v1237_v61, %s2790_s12 }
0x17a3   :  { %v1240_v1 = vpop.permute.xlu1 %1239 }
0x17a4   :  { %v1242_v2 = vadd.f32 %v1240_v1, %v1232_v63 }
0x17a6   :  { %2557 = vtanh.f32 %v1242_v2 }
0x17b3   :  { %v2558_v3 = vpop.eup %2557 }
0x17b4   :  { %1245 = vrot.lane.b32.xlu0 %v2558_v3, %s2790_s12  ;;  %v1563_v3 = vld [vmem:[#allocation3 + $0x8] sm:$0x3] }
0x1826   :  { %v1246_v8 = vpop.permute.xlu0 %1245 }
0x1827   :  { %v1248_v9 = vmul.f32 %v2556_v59, %v1246_v8 }
0x1829   :  { %1250 = vrot.lane.b32.xlu1 %v1248_v9, %s2798_s3 }
0x189b   :  { %v1251_v10 = vpop.permute.xlu1 %1250 }
0x189c   :  { %1253 = vst.msk [vmem:[#allocation2] sm:$0x3] %vm311_vm3, %v1251_v10  ;;  %2390 = vmatmul.mubr.msk.f32.vlgmr.msra.gmra.mxu1 %vm204_vm2, %v1251_v10 }
0x189d   :  { %2404 = vmatpush3.msra.mxu1 %v3038_v40  ;;  %2411 = vmatprep.mubr.msk.f32.mxu1 %vm2797_vm0, %v2796_v0 }
0x189e   :  { %2405 = vmatprep.subr.mxu1 %v2796_v0 }
0x189f   :  { %2406 = vmatpush3.msra.mxu1 %v3040_v41 }
0x18a0   :  { %2407 = vmatprep.subr.mxu1 %v2796_v0 }
0x18a1   :  { %2408 = vmatpush3.msra.mxu1 %v3045_v43 }
0x18a2   :  { %2409 = vmatprep.subr.mxu1 %v2796_v0 }
0x18a3   :  { %2410 = vmatpush3.msra.mxu1 %v3049_v45 }
0x18a4   :  { %2425 = vmatprep.subr.mxu1 %v2796_v0 }
0x195c   :  { %v1323_v12 = vpop.f32.mrf.mxu1 }
0x195d   :  { %v1327_v13 = vadd.f32 %v1323_v12, %v1254_v11 }
0x195e   :  { %v2391_v14 = vpop.f32.mrf.mxu1 }
0x195f   :  { %2559 = vtanh.f32 %v1327_v13  ;;  %v2155_v16 = vmul.f32 -1.442695, %v1327_v13 }
0x1961   :  { %2561 = vpow2.f32 %v2155_v16 }
0x196c   :  { %v2560_v15 = vpop.eup %2559 }
0x196d   :  { %1337 = vrot.lane.b32.xlu0 %v2560_v15, %s2790_s12 }
0x196e   :  { %v2562_v17 = vpop.eup %2561 }
0x196f   :  { %v1331_v18 = vadd.f32 1.0, %v2562_v17 }
0x1971   :  { %2563 = vrcp.f32 %v1331_v18 }
0x197e   :  { %v2564_v19 = vpop.eup %2563 }
0x197f   :  { %v1335_v22 = vmul.f32 %v2564_v19, %v1242_v2 }
0x19df   :  { %v1338_v20 = vpop.permute.xlu0 %1337 }
0x19e0   :  { %v1340_v21 = vmul.f32 %v2564_v19, %v1338_v20 }
0x19e2   :  { %1342 = vrot.lane.b32.xlu1 %v1340_v21, %s2790_s12 }
0x1a54   :  { %v1343_v23 = vpop.permute.xlu1 %1342 }
0x1a55   :  { %v1345_v24 = vadd.f32 %v1343_v23, %v1335_v22 }
0x1a57   :  { %2565 = vtanh.f32 %v1345_v24 }
0x1a64   :  { %v2566_v25 = vpop.eup %2565 }
0x1a65   :  { %1348 = vrot.lane.b32.xlu0 %v2566_v25, %s2790_s12  ;;  %v1666_v25 = vld [vmem:[#allocation3 + $0xa] sm:$0x3] }
0x1ad7   :  { %v1349_v26 = vpop.permute.xlu0 %1348 }
0x1ad8   :  { %v1351_v27 = vmul.f32 %v2564_v19, %v1349_v26 }
0x1ada   :  { %1353 = vrot.lane.b32.xlu1 %v1351_v27, %s2798_s3 }
0x1b4c   :  { %v1354_v28 = vpop.permute.xlu1 %1353 }
0x1b4d   :  { %1356 = vst.msk [vmem:[#allocation2 + $0x2] sm:$0x3] %vm311_vm3, %v1354_v28  ;;  %2401 = vmatmul.mubr.msk.f32.vlgmr.msra.gmra.mxu0 %vm204_vm2, %v1354_v28 }
0x1b4e   :  { %2415 = vmatpush3.msra.mxu0 %v3038_v40  ;;  %2422 = vmatprep.mubr.msk.f32.mxu0 %vm2797_vm0, %v2796_v0 }
0x1b4f   :  { %2416 = vmatprep.subr.mxu0 %v2796_v0 }
0x1b50   :  { %2417 = vmatpush3.msra.mxu0 %v3040_v41 }
0x1b51   :  { %2418 = vmatprep.subr.mxu0 %v2796_v0 }
0x1b52   :  { %2419 = vmatpush3.msra.mxu0 %v3045_v43 }
0x1b53   :  { %2420 = vmatprep.subr.mxu0 %v2796_v0 }
0x1b54   :  { %2421 = vmatpush3.msra.mxu0 %v3049_v45 }
0x1b55   :  { %2436 = vmatprep.subr.mxu0 %v2796_v0 }
0x1c0d   :  { %v1426_v30 = vpop.f32.mrf.mxu0 }
0x1c0e   :  { %v1430_v31 = vadd.f32 %v1426_v30, %v1357_v29 }
0x1c0f   :  { %v2402_v32 = vpop.f32.mrf.mxu0 }
0x1c10   :  { %2567 = vtanh.f32 %v1430_v31  ;;  %v2157_v35 = vmul.f32 -1.442695, %v1430_v31 }
0x1c12   :  { %2569 = vpow2.f32 %v2157_v35 }
0x1c1d   :  { %v2568_v33 = vpop.eup %2567 }
0x1c1e   :  { %1440 = vrot.lane.b32.xlu0 %v2568_v33, %s2790_s12 }
0x1c1f   :  { %v2570_v36 = vpop.eup %2569 }
0x1c20   :  { %v1434_v37 = vadd.f32 1.0, %v2570_v36 }
0x1c22   :  { %2571 = vrcp.f32 %v1434_v37 }
0x1c2f   :  { %v2572_v38 = vpop.eup %2571 }
0x1c30   :  { %v1438_v44 = vmul.f32 %v2572_v38, %v1345_v24 }
0x1c90   :  { %v1441_v39 = vpop.permute.xlu0 %1440 }
0x1c91   :  { %v1443_v42 = vmul.f32 %v2572_v38, %v1441_v39 }
0x1c93   :  { %1445 = vrot.lane.b32.xlu1 %v1443_v42, %s2790_s12  ;;  %v1769_v42 = vld [vmem:[#allocation3 + $0xc] sm:$0x3] }
0x1d05   :  { %v1446_v46 = vpop.permute.xlu1 %1445 }
0x1d06   :  { %v1448_v47 = vadd.f32 %v1446_v46, %v1438_v44 }
0x1d08   :  { %2573 = vtanh.f32 %v1448_v47 }
0x1d15   :  { %v2574_v48 = vpop.eup %2573 }
0x1d16   :  { %1451 = vrot.lane.b32.xlu0 %v2574_v48, %s2790_s12 }
0x1d88   :  { %v1452_v4 = vpop.permute.xlu0 %1451 }
0x1d89   :  { %v1454_v49 = vmul.f32 %v2572_v38, %v1452_v4 }
0x1d8b   :  { %1456 = vrot.lane.b32.xlu1 %v1454_v49, %s2798_s3 }
0x1dfd   :  { %v1457_v50 = vpop.permute.xlu1 %1456 }
0x1dfe   :  { %1459 = vst.msk [vmem:[#allocation2 + $0x4] sm:$0x3] %vm311_vm3, %v1457_v50  ;;  %2412 = vmatmul.mubr.msk.f32.vlgmr.msra.gmra.mxu1 %vm204_vm2, %v1457_v50 }
0x1dff   :  { %2426 = vmatpush3.msra.mxu1 %v3038_v40  ;;  %2433 = vmatprep.mubr.msk.f32.mxu1 %vm2797_vm0, %v2796_v0 }
0x1e00   :  { %2427 = vmatprep.subr.mxu1 %v2796_v0 }
0x1e01   :  { %2428 = vmatpush3.msra.mxu1 %v3040_v41 }
0x1e02   :  { %2429 = vmatprep.subr.mxu1 %v2796_v0 }
0x1e03   :  { %2430 = vmatpush3.msra.mxu1 %v3045_v43 }
0x1e04   :  { %2431 = vmatprep.subr.mxu1 %v2796_v0 }
0x1e05   :  { %2432 = vmatpush3.msra.mxu1 %v3049_v45 }
0x1e06   :  { %2447 = vmatprep.subr.mxu1 %v2796_v0 }
0x1ebe   :  { %v1529_v5 = vpop.f32.mrf.mxu1 }
0x1ebf   :  { %v1533_v52 = vadd.f32 %v1529_v5, %v1460_v51 }
0x1ec0   :  { %v2413_v6 = vpop.f32.mrf.mxu1 }
0x1ec1   :  { %2575 = vtanh.f32 %v1533_v52  ;;  %v2159_v54 = vmul.f32 -1.442695, %v1533_v52 }
0x1ec3   :  { %2577 = vpow2.f32 %v2159_v54 }
0x1ece   :  { %v2576_v53 = vpop.eup %2575 }
0x1ecf   :  { %1543 = vrot.lane.b32.xlu0 %v2576_v53, %s2790_s12 }
0x1ed0   :  { %v2578_v7 = vpop.eup %2577 }
0x1ed1   :  { %v1537_v55 = vadd.f32 1.0, %v2578_v7 }
0x1ed3   :  { %2579 = vrcp.f32 %v1537_v55 }
0x1ee0   :  { %v2580_v56 = vpop.eup %2579 }
0x1ee1   :  { %v1541_v59 = vmul.f32 %v2580_v56, %v1448_v47 }
0x1f41   :  { %v1544_v57 = vpop.permute.xlu0 %1543 }
0x1f42   :  { %v1546_v58 = vmul.f32 %v2580_v56, %v1544_v57 }
0x1f44   :  { %1548 = vrot.lane.b32.xlu1 %v1546_v58, %s2790_s12  ;;  %v1872_v58 = vld [vmem:[#allocation3 + $0xe] sm:$0x3] }
0x1fb6   :  { %v1549_v60 = vpop.permute.xlu1 %1548 }
0x1fb7   :  { %v1551_v61 = vadd.f32 %v1549_v60, %v1541_v59 }
0x1fb9   :  { %2581 = vtanh.f32 %v1551_v61 }
0x1fc6   :  { %v2582_v62 = vpop.eup %2581 }
0x1fc7   :  { %1554 = vrot.lane.b32.xlu0 %v2582_v62, %s2790_s12 }
0x2039   :  { %v1555_v63 = vpop.permute.xlu0 %1554 }
0x203a   :  { %v1557_v1 = vmul.f32 %v2580_v56, %v1555_v63 }
0x203c   :  { %1559 = vrot.lane.b32.xlu1 %v1557_v1, %s2798_s3 }
0x20ae   :  { %v1560_v2 = vpop.permute.xlu1 %1559 }
0x20af   :  { %1562 = vst.msk [vmem:[#allocation2 + $0x6] sm:$0x3] %vm311_vm3, %v1560_v2  ;;  %2423 = vmatmul.mubr.msk.f32.vlgmr.msra.gmra.mxu0 %vm204_vm2, %v1560_v2 }
0x20b0   :  { %2437 = vmatpush3.msra.mxu0 %v3038_v40  ;;  %2444 = vmatprep.mubr.msk.f32.mxu0 %vm2797_vm0, %v2796_v0 }
0x20b1   :  { %2438 = vmatprep.subr.mxu0 %v2796_v0 }
0x20b2   :  { %2439 = vmatpush3.msra.mxu0 %v3040_v41 }
0x20b3   :  { %2440 = vmatprep.subr.mxu0 %v2796_v0 }
0x20b4   :  { %2441 = vmatpush3.msra.mxu0 %v3045_v43 }
0x20b5   :  { %2442 = vmatprep.subr.mxu0 %v2796_v0 }
0x20b6   :  { %2443 = vmatpush3.msra.mxu0 %v3049_v45  ;;  %v1983_v39 = vld [vmem:[#allocation2] sm:$0xff] }
0x216f   :  { %v1632_v8 = vpop.f32.mrf.mxu0 }
0x2170   :  { %v1636_v9 = vadd.f32 %v1632_v8, %v1563_v3 }
0x2171   :  { %v2424_v10 = vpop.f32.mrf.mxu0 }
0x2172   :  { %2583 = vtanh.f32 %v1636_v9  ;;  %v2161_v12 = vmul.f32 -1.442695, %v1636_v9 }
0x2174   :  { %2585 = vpow2.f32 %v2161_v12 }
0x217f   :  { %v2584_v11 = vpop.eup %2583 }
0x2180   :  { %1646 = vrot.lane.b32.xlu0 %v2584_v11, %s2790_s12 }
0x2181   :  { %v2586_v13 = vpop.eup %2585 }
0x2182   :  { %v1640_v14 = vadd.f32 1.0, %v2586_v13 }
0x2184   :  { %2587 = vrcp.f32 %v1640_v14  ;;  %v1988_v14 = vld [vmem:[%s3225_s7 + $0x18] sm:$0xff] }
0x2185   :  { %2458 = vmatprep.subr.mxu0 %v1988_v14 }
0x2191   :  { %v2588_v15 = vpop.eup %2587 }
0x2192   :  { %v1644_v18 = vmul.f32 %v2588_v15, %v1551_v61 }
0x21f2   :  { %v1647_v16 = vpop.permute.xlu0 %1646 }
0x21f3   :  { %v1649_v17 = vmul.f32 %v2588_v15, %v1647_v16  ;;  %v1986_v16 = vld [vmem:[%s3225_s7 + $0x8] sm:$0xff] }
0x21f5   :  { %1651 = vrot.lane.b32.xlu1 %v1649_v17, %s2790_s12 }
0x2267   :  { %v1652_v19 = vpop.permute.xlu1 %1651 }
0x2268   :  { %v1654_v20 = vadd.f32 %v1652_v19, %v1644_v18 }
0x226a   :  { %2589 = vtanh.f32 %v1654_v20 }
0x2277   :  { %v2590_v21 = vpop.eup %2589 }
0x2278   :  { %1657 = vrot.lane.b32.xlu0 %v2590_v21, %s2790_s12 }
0x22ea   :  { %v1658_v22 = vpop.permute.xlu0 %1657 }
0x22eb   :  { %v1660_v23 = vmul.f32 %v2588_v15, %v1658_v22  ;;  %v1987_v15 = vld [vmem:[%s3225_s7 + $0x10] sm:$0xff] }
0x22ed   :  { %1662 = vrot.lane.b32.xlu1 %v1660_v23, %s2798_s3 }
0x235f   :  { %v1663_v24 = vpop.permute.xlu1 %1662 }
0x2360   :  { %1665 = vst.msk [vmem:[#allocation2 + $0x8] sm:$0x3] %vm311_vm3, %v1663_v24  ;;  %2434 = vmatmul.mubr.msk.f32.vlgmr.msra.gmra.mxu1 %vm204_vm2, %v1663_v24 }
0x2361   :  { %2448 = vmatpush3.msra.mxu1 %v3038_v40  ;;  %2455 = vmatprep.mubr.msk.f32.mxu1 %vm2797_vm0, %v2796_v0 }
0x2362   :  { %2449 = vmatprep.subr.mxu1 %v2796_v0 }
0x2363   :  { %2450 = vmatpush3.msra.mxu1 %v3040_v41 }
0x2364   :  { %2451 = vmatprep.subr.mxu1 %v2796_v0 }
0x2365   :  { %2452 = vmatpush3.msra.mxu1 %v3045_v43 }
0x2366   :  { %2453 = vmatprep.subr.mxu1 %v2796_v0 }
0x2367   :  { %2454 = vmatpush3.msra.mxu1 %v3049_v45 }
0x2420   :  { %v1735_v26 = vpop.f32.mrf.mxu1 }
0x2421   :  { %v1739_v27 = vadd.f32 %v1735_v26, %v1666_v25 }
0x2422   :  { %v2435_v28 = vpop.f32.mrf.mxu1 }
0x2423   :  { %2591 = vtanh.f32 %v1739_v27  ;;  %v2163_v29 = vmul.f32 -1.442695, %v1739_v27 }
0x2425   :  { %2593 = vpow2.f32 %v2163_v29 }
0x2430   :  { %v2592_v40 = vpop.eup %2591 }
0x2431   :  { %1749 = vrot.lane.b32.xlu0 %v2592_v40, %s2790_s12 }
0x2432   :  { %v2594_v30 = vpop.eup %2593 }
0x2433   :  { %v1743_v41 = vadd.f32 1.0, %v2594_v30 }
0x2435   :  { %2595 = vrcp.f32 %v1743_v41 }
0x2442   :  { %v2596_v31 = vpop.eup %2595 }
0x2443   :  { %v1747_v0 = vmul.f32 %v2596_v31, %v1654_v20 }
0x24a3   :  { %v1750_v32 = vpop.permute.xlu0 %1749 }
0x24a4   :  { %v1752_v43 = vmul.f32 %v2596_v31, %v1750_v32 }
0x24a6   :  { %1754 = vrot.lane.b32.xlu1 %v1752_v43, %s2790_s12 }
0x2518   :  { %v1755_v45 = vpop.permute.xlu1 %1754 }
0x2519   :  { %v1757_v33 = vadd.f32 %v1755_v45, %v1747_v0 }
0x251b   :  { %2597 = vtanh.f32 %v1757_v33 }
0x2528   :  { %v2598_v35 = vpop.eup %2597 }
0x2529   :  { %1760 = vrot.lane.b32.xlu0 %v2598_v35, %s2790_s12 }
0x259b   :  { %v1761_v36 = vpop.permute.xlu0 %1760 }
0x259c   :  { %v1763_v37 = vmul.f32 %v2596_v31, %v1761_v36 }
0x259e   :  { %1765 = vrot.lane.b32.xlu1 %v1763_v37, %s2798_s3 }
0x2610   :  { %v1766_v38 = vpop.permute.xlu1 %1765 }
0x2611   :  { %1768 = vst.msk [vmem:[#allocation2 + $0xa] sm:$0x3] %vm311_vm3, %v1766_v38  ;;  %2445 = vmatmul.mubr.msk.f32.vlgmr.msra.gmra.mxu0 %vm204_vm2, %v1766_v38 }
0x2612   :  { %2466 = vmatprep.mubr.msk.f32.mxu0 %vm204_vm2, %v1983_v39  ;;  %2459 = vmatpush3.msra.mxu0 %v1988_v14 }
0x2613   :  { %2460 = vmatprep.subr.mxu0 %v1987_v15 }
0x2614   :  { %2461 = vmatpush3.msra.mxu0 %v1987_v15 }
0x2615   :  { %2462 = vmatprep.subr.mxu0 %v1986_v16 }
0x2616   :  { %2463 = vmatpush3.msra.mxu0 %v1986_v16 }
0x26d1   :  { %v1838_v44 = vpop.f32.mrf.mxu0 }
0x26d2   :  { %v1842_v46 = vadd.f32 %v1838_v44, %v1769_v42 }
0x26d3   :  { %v2446_v47 = vpop.f32.mrf.mxu0 }
0x26d4   :  { %2599 = vtanh.f32 %v1842_v46  ;;  %v2165_v4 = vmul.f32 -1.442695, %v1842_v46 }
0x26d6   :  { %2601 = vpow2.f32 %v2165_v4 }
0x26e1   :  { %v2600_v48 = vpop.eup %2599 }
0x26e2   :  { %1852 = vrot.lane.b32.xlu0 %v2600_v48, %s2790_s12 }
0x26e3   :  { %v2602_v49 = vpop.eup %2601 }
0x26e4   :  { %v1846_v50 = vadd.f32 1.0, %v2602_v49 }
0x26e6   :  { %2603 = vrcp.f32 %v1846_v50 }
0x26f3   :  { %v2604_v51 = vpop.eup %2603 }
0x26f4   :  { %v1850_v6 = vmul.f32 %v2604_v51, %v1757_v33 }
0x2754   :  { %v1853_v5 = vpop.permute.xlu0 %1852 }
0x2755   :  { %v1855_v52 = vmul.f32 %v2604_v51, %v1853_v5 }
0x2757   :  { %1857 = vrot.lane.b32.xlu1 %v1855_v52, %s2790_s12 }
0x27c9   :  { %v1858_v53 = vpop.permute.xlu1 %1857 }
0x27ca   :  { %v1860_v54 = vadd.f32 %v1858_v53, %v1850_v6 }
0x27cc   :  { %2605 = vtanh.f32 %v1860_v54 }
0x27d9   :  { %v2606_v7 = vpop.eup %2605 }
0x27da   :  { %1863 = vrot.lane.b32.xlu0 %v2606_v7, %s2790_s12 }
0x284c   :  { %v1864_v55 = vpop.permute.xlu0 %1863 }
0x284d   :  { %v1866_v56 = vmul.f32 %v2604_v51, %v1864_v55 }
0x284f   :  { %1868 = vrot.lane.b32.xlu1 %v1866_v56, %s2798_s3 }
0x28c1   :  { %v1869_v57 = vpop.permute.xlu1 %1868 }
0x28c2   :  { %1871 = vst.msk [vmem:[#allocation2 + $0xc] sm:$0x3] %vm311_vm3, %v1869_v57  ;;  %2456 = vmatmul.mubr.msk.f32.vlgmr.msra.gmra.mxu1 %vm204_vm2, %v1869_v57 }
0x2982   :  { %v1941_v59 = vpop.f32.mrf.mxu1 }
0x2983   :  { %v1945_v60 = vadd.f32 %v1941_v59, %v1872_v58 }
0x2984   :  { %v2457_v61 = vpop.f32.mrf.mxu1 }
0x2985   :  { %2607 = vtanh.f32 %v1945_v60  ;;  %v2167_v63 = vmul.f32 -1.442695, %v1945_v60 }
0x2987   :  { %2609 = vpow2.f32 %v2167_v63 }
0x2992   :  { %v2608_v62 = vpop.eup %2607 }
0x2993   :  { %1955 = vrot.lane.b32.xlu0 %v2608_v62, %s2790_s12 }
0x2994   :  { %v2610_v1 = vpop.eup %2609 }
0x2995   :  { %v1949_v2 = vadd.f32 1.0, %v2610_v1 }
0x2997   :  { %2611 = vrcp.f32 %v1949_v2 }
0x29a4   :  { %v2612_v3 = vpop.eup %2611 }
0x29a5   :  { %v1953_v10 = vmul.f32 %v2612_v3, %v1860_v54 }
0x2a05   :  { %v1956_v8 = vpop.permute.xlu0 %1955 }
0x2a06   :  { %v1958_v9 = vmul.f32 %v2612_v3, %v1956_v8 }
0x2a08   :  { %1960 = vrot.lane.b32.xlu1 %v1958_v9, %s2790_s12 }
0x2a7a   :  { %v1961_v11 = vpop.permute.xlu1 %1960 }
0x2a7b   :  { %v1963_v12 = vadd.f32 %v1961_v11, %v1953_v10 }
0x2a7d   :  { %2613 = vtanh.f32 %v1963_v12 }
0x2a8a   :  { %v2614_v13 = vpop.eup %2613 }
0x2a8b   :  { %1966 = vrot.lane.b32.xlu0 %v2614_v13, %s2790_s12 }
0x2a8f   :  { %1036 = vrot.lane.b32.xlu0 %v3034_v34, %s2799_s1  ;;  %v1985_v34 = vld [vmem:[%s3225_s7] sm:$0xff]  ;;  %s2800_s7 = smov [#allocation14]  }
0x2a90   :  { %2464 = vmatprep.subr.mxu0 %v1985_v34  ;;  %s2096_s22 = sshll.u32 %s2800_s7, 4  ;;  %s2097_s22 = int_to_ptr.vmem [resolvable:$true] %s2096_s22 }
0x2a91   :  { %2465 = vmatpush3.msra.mxu0 %v1985_v34  ;;  %s2715_s23 = scalar_lea.vmem %s2097_s22, 64  ;;  %p2720_p12 = scmp.lt.s32.totalorder %s2097_s22, %s2097_s22 }
0x2a92   :  { %p2716_p11 = scmp.ne.s32.totalorder %s2097_s22, %s2715_s23  ;;  %p2721_p13 = scmp.lt.s32.totalorder %s2715_s23, %s2715_s23 }
0x2a94   :  { %p2722_p0 = por %p2721_p13, %p2720_p12 }
0x2a96   :  { %p2723_p1 = pnand %p2722_p0, %p2716_p11 }
0x2afd   :  { %v1967_v17 = vpop.permute.xlu0 %1966 }
0x2afe   :  { %v1969_v18 = vmul.f32 %v2612_v3, %v1967_v17 }
0x2b00   :  { %1971 = vrot.lane.b32.xlu1 %v1969_v18, %s2798_s3 }
0x2b01   :  { %v1037_v19 = vpop.permute.xlu0 %1036 }
0x2b02   :  { %1039 = vst.msk [vmem:[#allocation16] sm:$0x3] %vm311_vm3, %v1037_v19 }
0x2b04   :  { %1978 = vrot.lane.b32.xlu1 %v1963_v12, %s2799_s1 }
0x2b72   :  { %v1972_v20 = vpop.permute.xlu1 %1971 }
0x2b73   :  { %1974 = vst.msk [vmem:[#allocation2 + $0xe] sm:$0x3] %vm311_vm3, %v1972_v20  ;;  %1976 = vst.msk [vmem:[#allocation14 + $0x2] sm:$0x3] %vm311_vm3, %v1972_v20 }
0x2b76   :  { %v1979_v21 = vpop.permute.xlu1 %1978 }
0x2b77   :  { %1982 = vst.msk [vmem:[#allocation16 + $0x2] sm:$0x3] %vm311_vm3, %v1979_v21 }
0x2b7a   :  { %v1984_v22 = vld [vmem:[#allocation2 + $0x8] sm:$0xff] }
0x2b7b   :  { %2467 = vmatmul.mubr.msk.f32.vlgmr.msra.gmra.mxu0 %vm204_vm2, %v1984_v22 }
0x2b7c   :  { %2726 = shalt.err (!%p2723_p1)
}
0x2b7d   :  { %2102 = dma.vmem_to_hbm [thread:$0]  %s2097_s22, 64, %s3228_s10, [#allocation15], %s2790_s12, %s2790_s12, %s2791_s13  }
0x2b7e   :  { %s2801_s4 = smov [#allocation16]  }
0x2b7f   :  { %s2108_s26 = sshll.u32 %s2801_s4, 4  ;;  %s2109_s26 = int_to_ptr.vmem [resolvable:$true] %s2108_s26 }
0x2b80   :  { %s2735_s6 = scalar_lea.vmem %s2109_s26, 64  ;;  %p2740_p3 = scmp.lt.s32.totalorder %s2109_s26, %s2109_s26 }
0x2b81   :  { %p2736_p2 = scmp.ne.s32.totalorder %s2109_s26, %s2735_s6  ;;  %p2741_p4 = scmp.lt.s32.totalorder %s2735_s6, %s2735_s6 }
0x2b83   :  { %p2742_p5 = por %p2741_p4, %p2740_p3 }
0x2b85   :  { %p2743_p6 = pnand %p2742_p5, %p2736_p2 }
0x2b87   :  { %2746 = shalt.err (!%p2743_p6)
}
0x2b88   :  { %2114 = dma.vmem_to_hbm [thread:$0]  %s2109_s26, 64, %s3229_s11, [#allocation15], %s2790_s12, %s2790_s12, %s2791_s13  }
0x2b89   :  { %v2168_v23 = vld [vmem:[%s3226_s8] ss:$0 sm:$0xff]  ;;  %s2802_s10 = smov [#allocation13]  }
0x2b8a   :  { %s2084_s14 = sshll.u32 %s2802_s10, 4  ;;  %s2085_s14 = int_to_ptr.vmem [resolvable:$true] %s2084_s14 }
0x2b8b   :  { %s2755_s15 = scalar_lea.vmem %s2085_s14, 256  ;;  %p2760_p8 = scmp.lt.s32.totalorder %s2085_s14, %s2085_s14 }
0x2b8c   :  { %p2756_p7 = scmp.ne.s32.totalorder %s2085_s14, %s2755_s15  ;;  %p2761_p9 = scmp.lt.s32.totalorder %s2755_s15, %s2755_s15 }
0x2b8e   :  { %p2762_p10 = por %p2761_p9, %p2760_p8 }
0x2b90   :  { %p2763_p11 = pnand %p2762_p10, %p2756_p7 }
0x2c3b   :  { %v2468_v24 = vpop.f32.mrf.mxu0 }
0x2c3c   :  { %v2074_v25 = vadd.f32 %v2468_v24, %v2168_v23 }
0x2c3d   :  { %v2068_v26 = vpop.f32.mrf.mxu0 }
0x2c3e   :  { %2078 = vst [vmem:[#allocation13 + $0x8] sm:$0xff] %v2074_v25  ;;  %v2069_v27 = vadd.f32 %v2168_v23, %v2068_v26 }
0x2c40   :  { %2077 = vst [vmem:[#allocation13] sm:$0xff] %v2069_v27 }
0x2c41   :  { %2766 = shalt.err (!%p2763_p11)
}
0x2c42   :  { %2090 = dma.vmem_to_hbm [thread:$0]  %s2085_s14, 256, %s3227_s9, [#allocation6], %s2788_s27, %s2788_s27, %s2789_s28  }
0x2c43   :  { %2781 = dma.done.wait [#allocation6], 256  }
0x2c44   :  { %2782 = vsyncadd [#allocation6], 4294967040 }
0x2c45   :  { %2783 = dma.done.wait [#allocation15], 128  }
0x2c46   :  { %2784 = vsyncadd [#allocation15], 4294967168 }
0x2c47   :  { %2124 = vsyncpa [#allocation5], 1 }
0x2c48   :  { %2125 = vsyncpa [#allocation8], 1 }
0x2c49   :  { %2126 = vsyncpa [#allocation11], 1 }
0x2c4a   :  { %2127 = vsyncpa [#allocation6], 1 }
0x2c4b   :  { %2128 = vsyncpa [#allocation15], 1 }

</bundles_post_ra>
